<compile_context>
chip_gen: v7x
topology: tpu7x:2x2x1
jax: 0.10.0
libtpu: 0.0.40
codegen_flags: <defaults>
</compile_context>

<pallas_src>
import functools

import jax
import jax.numpy as jnp
from jax.experimental import pallas as pl
from jax.experimental.pallas import tpu as pltpu


def _round_up(x, m):
    return (x + m - 1) // m * m


# ----------------------------- host-side im2col (layout glue) -----------------------------
def _im2col_3x3(frames):
    # frames: (N, C, H, W) NCHW -> (N, H*W, C*9), K index = c*9 + kh*3 + kw
    # (matches conv_w.reshape(C_hid, C*9) ordering)
    N, C, H, W = frames.shape
    xp = jnp.pad(frames, ((0, 0), (0, 0), (1, 1), (1, 1)))
    cols = [xp[:, :, kh:kh + H, kw:kw + W] for kh in range(3) for kw in range(3)]
    patches = jnp.stack(cols, axis=2)                      # (N, C, 9, H, W)
    return patches.transpose(0, 3, 4, 1, 2).reshape(N, H * W, C * 9)


# ------------------------------- fused whole-model kernel -------------------------------
def _nelson_kernel(patches_ref, prev_ref, hc0_ref, wide_ref, nar_ref, o_ref, *,
                   B, T_p, T_a, HW, C_hid, K, H, z_size,
                   r_wprev, r_wcnn, r_whh, r_bprev, r_baud,
                   r_wc, r_bc, r_wout, r_bout):
    f32 = jnp.float32
    T = T_p + T_a
    N = T_a * B

    # ---- unpack packed weight slabs (static VMEM slices; no extra DMAs) ----
    w_prev_ih = wide_ref[r_wprev:r_wprev + z_size, :]      # (z, 4H)   prev_fc folded into W_ih
    w_cnn_ih = wide_ref[r_wcnn:r_wcnn + C_hid, :]          # (C_hid,4H) cnn_fc folded into W_ih
    whhT = wide_ref[r_whh:r_whh + H, :]                    # (H, 4H)
    b_prev = wide_ref[r_bprev:r_bprev + 1, :]              # (1, 4H)   prev_fc_b@W_ih^T + b_ih + b_hh
    b_aud = wide_ref[r_baud:r_baud + 1, :]                 # (1, 4H)   cnn_fc_b@W_ih^T + b_ih + b_hh

    wcT = nar_ref[r_wc:r_wc + K, 0:C_hid]                  # (C*9, C_hid)
    bc = nar_ref[r_bc:r_bc + 1, 0:C_hid]                   # (1, C_hid)
    woutT = nar_ref[r_wout:r_wout + H, 0:z_size]           # (H, z)
    bout = nar_ref[r_bout:r_bout + 1, 0:z_size]            # (1, z)

    # ---- audio encoder, all frames at once: conv-as-matmul -> ReLU -> mean over HW ----
    conv = jnp.dot(patches_ref[...], wcT, preferred_element_type=f32) + bc   # (N*HW, C_hid)
    conv = jnp.maximum(conv, 0.0)
    # global average pool as an f32 reduce (no pooling-matrix matmul)
    pooled = jnp.sum(conv.reshape(N, HW, C_hid), axis=1) * (1.0 / HW)        # (N, C_hid)

    # ---- whole-sequence input->hidden projections, FCs and LSTM biases pre-folded ----
    zx_audio = jnp.dot(pooled, w_cnn_ih, preferred_element_type=f32) + b_aud          # (Ta*B, 4H)
    zx_prev = jnp.dot(prev_ref[...], w_prev_ih, preferred_element_type=f32) + b_prev  # (Tp*B, 4H)

    h = hc0_ref[0:B, :].astype(f32)
    c = hc0_ref[B:2 * B, :].astype(f32)

    # ---- recurrence: only h@W_hh^T + gate nonlinearities remain on the serial path ----
    hs = []
    for t in range(T):
        if t < T_p:
            zx_t = zx_prev[t * B:(t + 1) * B, :]
        else:
            ta = t - T_p
            zx_t = zx_audio[ta * B:(ta + 1) * B, :]
        z = zx_t + jnp.dot(h, whhT, preferred_element_type=f32)             # (B, 4H)
        i_g = jax.nn.sigmoid(z[:, 0:H])
        f_g = jax.nn.sigmoid(z[:, H:2 * H])
        g_g = jnp.tanh(z[:, 2 * H:3 * H])
        o_g = jax.nn.sigmoid(z[:, 3 * H:4 * H])
        c = f_g * c + i_g * g_g
        h = o_g * jnp.tanh(c)
        hs.append(h)

    # ---- fc_out hoisted out of the loop: one matmul + one output store ----
    h_all = jnp.concatenate(hs, axis=0)                                      # (T*B, H)
    y = jnp.dot(h_all, woutT, preferred_element_type=f32) + bout             # (T*B, z)
    o_ref[...] = y.astype(o_ref.dtype)


# ------------------------------------ model wrapper ------------------------------------
def nelson_forward(params, audio_inputs, prev_steps, h):
    h0, c0 = h                                              # (n_layers, B, H) each
    B, T_p, z_size = prev_steps.shape
    _, T_a, C, Hi, Wi = audio_inputs.shape
    T = T_p + T_a
    C_hid = params["conv_w"].shape[0]
    n_hidden = params["w_hh"].shape[1]
    H4 = 4 * n_hidden
    K = C * 9
    HW = Hi * Wi
    N = T_a * B
    f32 = jnp.float32

    # Time-major orderings so the kernel reads contiguous (B, ...) row blocks per step.
    frames_tm = jnp.transpose(audio_inputs, (1, 0, 2, 3, 4)).reshape(N, C, Hi, Wi)
    patches = _im2col_3x3(frames_tm).reshape(N * HW, K).astype(f32)          # (Ta*B*HW, C*9)
    prev_tm = jnp.transpose(prev_steps, (1, 0, 2)).reshape(T_p * B, z_size).astype(f32)

    # --- fold prev_steps_fc / cnn_fc and LSTM biases into the input->hidden projection ---
    w_ih_T = params["w_ih"].T.astype(f32)                                    # (dim, 4H)
    w_prev_ih = params["prev_fc_w"].T.astype(f32) @ w_ih_T                   # (z, 4H)
    w_cnn_ih = params["cnn_fc_w"].T.astype(f32) @ w_ih_T                     # (C_hid, 4H)
    b_lstm = (params["b_ih"] + params["b_hh"]).astype(f32)
    b_prev = params["prev_fc_b"].astype(f32) @ w_ih_T + b_lstm               # (4H,)
    b_aud = params["cnn_fc_b"].astype(f32) @ w_ih_T + b_lstm                 # (4H,)

    # --- pack weights/biases into two padded slabs (2 DMAs instead of ~14) ---
    r_wprev = 0
    r_wcnn = _round_up(z_size, 8)
    r_whh = r_wcnn + _round_up(C_hid, 8)
    r_bprev = r_whh + _round_up(n_hidden, 8)
    r_baud = r_bprev + 1
    wide_rows = _round_up(r_baud + 1, 8)
    wide = jnp.zeros((wide_rows, H4), f32)
    wide = wide.at[r_wprev:r_wprev + z_size].set(w_prev_ih)
    wide = wide.at[r_wcnn:r_wcnn + C_hid].set(w_cnn_ih)
    wide = wide.at[r_whh:r_whh + n_hidden].set(params["w_hh"].T.astype(f32))
    wide = wide.at[r_bprev].set(b_prev)
    wide = wide.at[r_baud].set(b_aud)

    nl = max(C_hid, z_size)
    r_wc = 0
    r_bc = _round_up(K, 8)
    r_wout = r_bc + 8
    r_bout = r_wout + _round_up(n_hidden, 8)
    nar_rows = _round_up(r_bout + 1, 8)
    nar = jnp.zeros((nar_rows, nl), f32)
    nar = nar.at[0:K, 0:C_hid].set(params["conv_w"].reshape(C_hid, K).T.astype(f32))
    nar = nar.at[r_bc, 0:C_hid].set(params["conv_b"].astype(f32))
    nar = nar.at[r_wout:r_wout + n_hidden, 0:z_size].set(params["fc_out_w"].T.astype(f32))
    nar = nar.at[r_bout, 0:z_size].set(params["fc_out_b"].astype(f32))

    hc0 = jnp.concatenate([h0[0], c0[0]], axis=0).astype(f32)                # (2B, H)

    kernel = functools.partial(
        _nelson_kernel, B=B, T_p=T_p, T_a=T_a, HW=HW, C_hid=C_hid, K=K,
        H=n_hidden, z_size=z_size,
        r_wprev=r_wprev, r_wcnn=r_wcnn, r_whh=r_whh, r_bprev=r_bprev, r_baud=r_baud,
        r_wc=r_wc, r_bc=r_bc, r_wout=r_wout, r_bout=r_bout)

    operands = (patches, prev_tm, hc0, wide, nar)
    op_bytes = sum(int(x.size) * x.dtype.itemsize for x in operands) + T * B * z_size * 4
    vmem_limit = int(max(16 << 20, 8 * op_bytes))   # explicit budget; tiny here, headroom ample

    out_tm = pl.pallas_call(
        kernel,
        out_shape=jax.ShapeDtypeStruct((T * B, z_size), prev_steps.dtype),
        compiler_params=pltpu.CompilerParams(vmem_limit_bytes=vmem_limit),
    )(*operands)

    return jnp.transpose(out_tm.reshape(T, B, z_size), (1, 0, 2))            # (B, T, z_size)


# ---------------------------------- pure-JAX reference ----------------------------------
def nelson_reference(params, audio_inputs, prev_steps, h):
    h0, c0 = h
    B, T_p, z_size = prev_steps.shape
    _, T_a, C, Hi, Wi = audio_inputs.shape
    C_hid = params["conv_w"].shape[0]
    K = C * 9

    prev_feat = prev_steps @ params["prev_fc_w"].T + params["prev_fc_b"]     # (B, T_p, dim)

    frames = audio_inputs.reshape(B * T_a, C, Hi, Wi)
    patches = _im2col_3x3(frames)                                            # (N, HW, K)
    conv = patches @ params["conv_w"].reshape(C_hid, K).T + params["conv_b"]
    conv = jnp.maximum(conv, 0.0)
    pooled = conv.mean(axis=1)                                               # (N, C_hid)
    afeat = (pooled @ params["cnn_fc_w"].T + params["cnn_fc_b"]).reshape(B, T_a, -1)

    x = jnp.concatenate([prev_feat, afeat], axis=1)                          # (B, T, dim)
    Hh = params["w_hh"].shape[1]

    def step(carry, x_t):
        h_, c_ = carry
        z = (x_t @ params["w_ih"].T + params["b_ih"]
             + h_ @ params["w_hh"].T + params["b_hh"])
        i = jax.nn.sigmoid(z[:, :Hh]); f = jax.nn.sigmoid(z[:, Hh:2 * Hh])
        g = jnp.tanh(z[:, 2 * Hh:3 * Hh]); o = jax.nn.sigmoid(z[:, 3 * Hh:4 * Hh])
        c2 = f * c_ + i * g
        h2 = o * jnp.tanh(c2)
        return (h2, c2), h2

    _, hs = jax.lax.scan(step, (h0[0], c0[0]), jnp.transpose(x, (1, 0, 2)))
    hs = jnp.transpose(hs, (1, 0, 2))                                        # (B, T, Hh)
    return hs @ params["fc_out_w"].T + params["fc_out_b"]


if __name__ == "__main__":
    # Small, forward-consistent shapes
    B, z_size, dim, n_hidden, n_layers = 2, 8, 16, 32, 1
    T_prev, T_audio = 3, 4
    C_in, Himg, Wimg = 2, 8, 8
    C_hid = 8

    key = jax.random.PRNGKey(0)
    keys = jax.random.split(key, 16)
    scale = 0.1

    params = {
        # prev_steps_fc: Linear(z_size -> dim)
        "prev_fc_w": scale * jax.random.normal(keys[0], (dim, z_size), jnp.float32),
        "prev_fc_b": scale * jax.random.normal(keys[1], (dim,), jnp.float32),
        # cnnEncoder(dim): Conv2d(C_in, C_hid, 3, pad=1) + Linear(C_hid -> dim)
        "conv_w": scale * jax.random.normal(keys[2], (C_hid, C_in, 3, 3), jnp.float32),
        "conv_b": scale * jax.random.normal(keys[3], (C_hid,), jnp.float32),
        "cnn_fc_w": scale * jax.random.normal(keys[4], (dim, C_hid), jnp.float32),
        "cnn_fc_b": scale * jax.random.normal(keys[5], (dim,), jnp.float32),
        # LSTM(dim -> n_hidden), PyTorch gate order [i, f, g, o]
        "w_ih": scale * jax.random.normal(keys[6], (4 * n_hidden, dim), jnp.float32),
        "w_hh": scale * jax.random.normal(keys[7], (4 * n_hidden, n_hidden), jnp.float32),
        "b_ih": scale * jax.random.normal(keys[8], (4 * n_hidden,), jnp.float32),
        "b_hh": scale * jax.random.normal(keys[9], (4 * n_hidden,), jnp.float32),
        # fc_out: Linear(n_hidden -> z_size)
        "fc_out_w": scale * jax.random.normal(keys[10], (z_size, n_hidden), jnp.float32),
        "fc_out_b": scale * jax.random.normal(keys[11], (z_size,), jnp.float32),
    }

    audio_inputs = jax.random.normal(keys[12], (B, T_audio, C_in, Himg, Wimg), jnp.float32)
    prev_steps = jax.random.normal(keys[13], (B, T_prev, z_size), jnp.float32)
    h = (jnp.zeros((n_layers, B, n_hidden), jnp.float32),
         jnp.zeros((n_layers, B, n_hidden), jnp.float32))   # init_hidden(B)

    fwd = jax.jit(nelson_forward)
    out = jax.block_until_ready(fwd(params, audio_inputs, prev_steps, h))
    assert out.shape == (B, T_prev + T_audio, z_size)

    ref = jax.block_until_ready(nelson_reference(params, audio_inputs, prev_steps, h))
    max_err = float(jnp.max(jnp.abs(out - ref)))
    assert max_err < 1e-3, f"mismatch vs reference: {max_err}"

    print("KERNEL_OK")
</pallas_src>

<mosaic_0001>
module attributes {stable_mosaic.version = 11 : i64} {
  func.func @_nelson_kernel(%arg0: memref<512x18xf32, #tpu.memory_space<vmem>>, %arg1: memref<6x8xf32, #tpu.memory_space<vmem>>, %arg2: memref<4x32xf32, #tpu.memory_space<vmem>>, %arg3: memref<56x128xf32, #tpu.memory_space<vmem>>, %arg4: memref<72x8xf32, #tpu.memory_space<vmem>>, %arg5: memref<14x8xf32, #tpu.memory_space<vmem>>) attributes {dimension_semantics = [], scalar_prefetch = 0 : i64, scratch_operands = 0 : i64, tpu.core_type = #tpu.core_type<tc>} {
    %c0 = arith.constant 0 : index
    %c0_0 = arith.constant 0 : index
    %0 = vector.load %arg3[%c0, %c0_0] : memref<56x128xf32, #tpu.memory_space<vmem>>, vector<8x128xf32>
    %c8 = arith.constant 8 : index
    %c0_1 = arith.constant 0 : index
    %1 = vector.load %arg3[%c8, %c0_1] : memref<56x128xf32, #tpu.memory_space<vmem>>, vector<8x128xf32>
    %c16 = arith.constant 16 : index
    %c0_2 = arith.constant 0 : index
    %2 = vector.load %arg3[%c16, %c0_2] : memref<56x128xf32, #tpu.memory_space<vmem>>, vector<32x128xf32>
    %c48 = arith.constant 48 : index
    %c0_3 = arith.constant 0 : index
    %3 = vector.load %arg3[%c48, %c0_3] : memref<56x128xf32, #tpu.memory_space<vmem>>, vector<1x128xf32>
    %c49 = arith.constant 49 : index
    %c0_4 = arith.constant 0 : index
    %4 = vector.load %arg3[%c49, %c0_4] : memref<56x128xf32, #tpu.memory_space<vmem>>, vector<1x128xf32>
    %c0_5 = arith.constant 0 : index
    %c0_6 = arith.constant 0 : index
    %5 = vector.load %arg4[%c0_5, %c0_6] : memref<72x8xf32, #tpu.memory_space<vmem>>, vector<18x8xf32>
    %c24 = arith.constant 24 : index
    %c0_7 = arith.constant 0 : index
    %6 = vector.load %arg4[%c24, %c0_7] : memref<72x8xf32, #tpu.memory_space<vmem>>, vector<1x8xf32>
    %c32 = arith.constant 32 : index
    %c0_8 = arith.constant 0 : index
    %7 = vector.load %arg4[%c32, %c0_8] : memref<72x8xf32, #tpu.memory_space<vmem>>, vector<32x8xf32>
    %c64 = arith.constant 64 : index
    %c0_9 = arith.constant 0 : index
    %8 = vector.load %arg4[%c64, %c0_9] : memref<72x8xf32, #tpu.memory_space<vmem>>, vector<1x8xf32>
    %c0_10 = arith.constant 0 : index
    %c0_11 = arith.constant 0 : index
    %9 = vector.load %arg0[%c0_10, %c0_11] : memref<512x18xf32, #tpu.memory_space<vmem>>, vector<512x18xf32>
    %cst = arith.constant dense<0.000000e+00> : vector<512x8xf32>
    %10 = tpu.matmul %9, %5, %cst {dimension_numbers = #tpu.dot_dimension_numbers<[1], [0], [0], [1], [0, 0, 1, 1], [], []>} : vector<512x18xf32>, vector<18x8xf32>, vector<512x8xf32> -> vector<512x8xf32>
    %11 = vector.broadcast %6 : vector<1x8xf32> to vector<512x8xf32>
    %12 = arith.addf %10, %11 : vector<512x8xf32>
    %cst_12 = arith.constant 0.000000e+00 : f32
    %13 = vector.broadcast %cst_12 : f32 to vector<512x8xf32>
    %14 = arith.maximumf %12, %13 : vector<512x8xf32>
    %15 = vector.shape_cast %14 : vector<512x8xf32> to vector<8x64x8xf32>
    %cst_13 = arith.constant dense<0.000000e+00> : vector<8x8xf32>
    %16 = vector.multi_reduction <add>, %15, %cst_13 [1] : vector<8x64x8xf32> to vector<8x8xf32>
    %cst_14 = arith.constant 1.562500e-02 : f32
    %17 = vector.broadcast %cst_14 : f32 to vector<8x8xf32>
    %18 = arith.mulf %16, %17 : vector<8x8xf32>
    %cst_15 = arith.constant dense<0.000000e+00> : vector<8x128xf32>
    %19 = tpu.matmul %18, %1, %cst_15 {dimension_numbers = #tpu.dot_dimension_numbers<[1], [0], [0], [1], [0, 0, 1, 1], [], []>} : vector<8x8xf32>, vector<8x128xf32>, vector<8x128xf32> -> vector<8x128xf32>
    %20 = vector.broadcast %4 : vector<1x128xf32> to vector<8x128xf32>
    %21 = arith.addf %19, %20 : vector<8x128xf32>
    %c0_16 = arith.constant 0 : index
    %c0_17 = arith.constant 0 : index
    %22 = vector.load %arg1[%c0_16, %c0_17] : memref<6x8xf32, #tpu.memory_space<vmem>>, vector<6x8xf32>
    %cst_18 = arith.constant dense<0.000000e+00> : vector<6x128xf32>
    %23 = tpu.matmul %22, %0, %cst_18 {dimension_numbers = #tpu.dot_dimension_numbers<[1], [0], [0], [1], [0, 0, 1, 1], [], []>} : vector<6x8xf32>, vector<8x128xf32>, vector<6x128xf32> -> vector<6x128xf32>
    %24 = vector.broadcast %3 : vector<1x128xf32> to vector<6x128xf32>
    %25 = arith.addf %23, %24 : vector<6x128xf32>
    %c0_19 = arith.constant 0 : index
    %c0_20 = arith.constant 0 : index
    %26 = vector.load %arg2[%c0_19, %c0_20] : memref<4x32xf32, #tpu.memory_space<vmem>>, vector<2x32xf32>
    %c2 = arith.constant 2 : index
    %c0_21 = arith.constant 0 : index
    %27 = vector.load %arg2[%c2, %c0_21] : memref<4x32xf32, #tpu.memory_space<vmem>>, vector<2x32xf32>
    %28 = vector.extract_strided_slice %25 {offsets = [0, 0], sizes = [2, 128], strides = [1, 1]} : vector<6x128xf32> to vector<2x128xf32>
    %cst_22 = arith.constant dense<0.000000e+00> : vector<2x128xf32>
    %29 = tpu.matmul %26, %2, %cst_22 {dimension_numbers = #tpu.dot_dimension_numbers<[1], [0], [0], [1], [0, 0, 1, 1], [], []>} : vector<2x32xf32>, vector<32x128xf32>, vector<2x128xf32> -> vector<2x128xf32>
    %30 = arith.addf %28, %29 : vector<2x128xf32>
    %31 = vector.extract_strided_slice %30 {offsets = [0, 0], sizes = [2, 32], strides = [1, 1]} : vector<2x128xf32> to vector<2x32xf32>
    %32 = arith.negf %31 : vector<2x32xf32>
    %33 = math.exp %32 : vector<2x32xf32>
    %cst_23 = arith.constant 1.000000e+00 : f32
    %34 = vector.broadcast %cst_23 : f32 to vector<2x32xf32>
    %35 = arith.addf %34, %33 : vector<2x32xf32>
    %36 = arith.divf %34, %35 : vector<2x32xf32>
    %37 = vector.extract_strided_slice %30 {offsets = [0, 32], sizes = [2, 32], strides = [1, 1]} : vector<2x128xf32> to vector<2x32xf32>
    %38 = arith.negf %37 : vector<2x32xf32>
    %39 = math.exp %38 : vector<2x32xf32>
    %cst_24 = arith.constant 1.000000e+00 : f32
    %40 = vector.broadcast %cst_24 : f32 to vector<2x32xf32>
    %41 = arith.addf %40, %39 : vector<2x32xf32>
    %42 = arith.divf %40, %41 : vector<2x32xf32>
    %43 = vector.extract_strided_slice %30 {offsets = [0, 64], sizes = [2, 32], strides = [1, 1]} : vector<2x128xf32> to vector<2x32xf32>
    %44 = math.tanh %43 : vector<2x32xf32>
    %45 = vector.extract_strided_slice %30 {offsets = [0, 96], sizes = [2, 32], strides = [1, 1]} : vector<2x128xf32> to vector<2x32xf32>
    %46 = arith.negf %45 : vector<2x32xf32>
    %47 = math.exp %46 : vector<2x32xf32>
    %cst_25 = arith.constant 1.000000e+00 : f32
    %48 = vector.broadcast %cst_25 : f32 to vector<2x32xf32>
    %49 = arith.addf %48, %47 : vector<2x32xf32>
    %50 = arith.divf %48, %49 : vector<2x32xf32>
    %51 = arith.mulf %42, %27 : vector<2x32xf32>
    %52 = arith.mulf %36, %44 : vector<2x32xf32>
    %53 = arith.addf %51, %52 : vector<2x32xf32>
    %54 = math.tanh %53 : vector<2x32xf32>
    %55 = arith.mulf %50, %54 : vector<2x32xf32>
    %56 = vector.extract_strided_slice %25 {offsets = [2, 0], sizes = [2, 128], strides = [1, 1]} : vector<6x128xf32> to vector<2x128xf32>
    %cst_26 = arith.constant dense<0.000000e+00> : vector<2x128xf32>
    %57 = tpu.matmul %55, %2, %cst_26 {dimension_numbers = #tpu.dot_dimension_numbers<[1], [0], [0], [1], [0, 0, 1, 1], [], []>} : vector<2x32xf32>, vector<32x128xf32>, vector<2x128xf32> -> vector<2x128xf32>
    %58 = arith.addf %56, %57 : vector<2x128xf32>
    %59 = vector.extract_strided_slice %58 {offsets = [0, 0], sizes = [2, 32], strides = [1, 1]} : vector<2x128xf32> to vector<2x32xf32>
    %60 = arith.negf %59 : vector<2x32xf32>
    %61 = math.exp %60 : vector<2x32xf32>
    %cst_27 = arith.constant 1.000000e+00 : f32
    %62 = vector.broadcast %cst_27 : f32 to vector<2x32xf32>
    %63 = arith.addf %62, %61 : vector<2x32xf32>
    %64 = arith.divf %62, %63 : vector<2x32xf32>
    %65 = vector.extract_strided_slice %58 {offsets = [0, 32], sizes = [2, 32], strides = [1, 1]} : vector<2x128xf32> to vector<2x32xf32>
    %66 = arith.negf %65 : vector<2x32xf32>
    %67 = math.exp %66 : vector<2x32xf32>
    %cst_28 = arith.constant 1.000000e+00 : f32
    %68 = vector.broadcast %cst_28 : f32 to vector<2x32xf32>
    %69 = arith.addf %68, %67 : vector<2x32xf32>
    %70 = arith.divf %68, %69 : vector<2x32xf32>
    %71 = vector.extract_strided_slice %58 {offsets = [0, 64], sizes = [2, 32], strides = [1, 1]} : vector<2x128xf32> to vector<2x32xf32>
    %72 = math.tanh %71 : vector<2x32xf32>
    %73 = vector.extract_strided_slice %58 {offsets = [0, 96], sizes = [2, 32], strides = [1, 1]} : vector<2x128xf32> to vector<2x32xf32>
    %74 = arith.negf %73 : vector<2x32xf32>
    %75 = math.exp %74 : vector<2x32xf32>
    %cst_29 = arith.constant 1.000000e+00 : f32
    %76 = vector.broadcast %cst_29 : f32 to vector<2x32xf32>
    %77 = arith.addf %76, %75 : vector<2x32xf32>
    %78 = arith.divf %76, %77 : vector<2x32xf32>
    %79 = arith.mulf %70, %53 : vector<2x32xf32>
    %80 = arith.mulf %64, %72 : vector<2x32xf32>
    %81 = arith.addf %79, %80 : vector<2x32xf32>
    %82 = math.tanh %81 : vector<2x32xf32>
    %83 = arith.mulf %78, %82 : vector<2x32xf32>
    %84 = vector.extract_strided_slice %25 {offsets = [4, 0], sizes = [2, 128], strides = [1, 1]} : vector<6x128xf32> to vector<2x128xf32>
    %cst_30 = arith.constant dense<0.000000e+00> : vector<2x128xf32>
    %85 = tpu.matmul %83, %2, %cst_30 {dimension_numbers = #tpu.dot_dimension_numbers<[1], [0], [0], [1], [0, 0, 1, 1], [], []>} : vector<2x32xf32>, vector<32x128xf32>, vector<2x128xf32> -> vector<2x128xf32>
    %86 = arith.addf %84, %85 : vector<2x128xf32>
    %87 = vector.extract_strided_slice %86 {offsets = [0, 0], sizes = [2, 32], strides = [1, 1]} : vector<2x128xf32> to vector<2x32xf32>
    %88 = arith.negf %87 : vector<2x32xf32>
    %89 = math.exp %88 : vector<2x32xf32>
    %cst_31 = arith.constant 1.000000e+00 : f32
    %90 = vector.broadcast %cst_31 : f32 to vector<2x32xf32>
    %91 = arith.addf %90, %89 : vector<2x32xf32>
    %92 = arith.divf %90, %91 : vector<2x32xf32>
    %93 = vector.extract_strided_slice %86 {offsets = [0, 32], sizes = [2, 32], strides = [1, 1]} : vector<2x128xf32> to vector<2x32xf32>
    %94 = arith.negf %93 : vector<2x32xf32>
    %95 = math.exp %94 : vector<2x32xf32>
    %cst_32 = arith.constant 1.000000e+00 : f32
    %96 = vector.broadcast %cst_32 : f32 to vector<2x32xf32>
    %97 = arith.addf %96, %95 : vector<2x32xf32>
    %98 = arith.divf %96, %97 : vector<2x32xf32>
    %99 = vector.extract_strided_slice %86 {offsets = [0, 64], sizes = [2, 32], strides = [1, 1]} : vector<2x128xf32> to vector<2x32xf32>
    %100 = math.tanh %99 : vector<2x32xf32>
    %101 = vector.extract_strided_slice %86 {offsets = [0, 96], sizes = [2, 32], strides = [1, 1]} : vector<2x128xf32> to vector<2x32xf32>
    %102 = arith.negf %101 : vector<2x32xf32>
    %103 = math.exp %102 : vector<2x32xf32>
    %cst_33 = arith.constant 1.000000e+00 : f32
    %104 = vector.broadcast %cst_33 : f32 to vector<2x32xf32>
    %105 = arith.addf %104, %103 : vector<2x32xf32>
    %106 = arith.divf %104, %105 : vector<2x32xf32>
    %107 = arith.mulf %98, %81 : vector<2x32xf32>
    %108 = arith.mulf %92, %100 : vector<2x32xf32>
    %109 = arith.addf %107, %108 : vector<2x32xf32>
    %110 = math.tanh %109 : vector<2x32xf32>
    %111 = arith.mulf %106, %110 : vector<2x32xf32>
    %112 = vector.extract_strided_slice %21 {offsets = [0, 0], sizes = [2, 128], strides = [1, 1]} : vector<8x128xf32> to vector<2x128xf32>
    %cst_34 = arith.constant dense<0.000000e+00> : vector<2x128xf32>
    %113 = tpu.matmul %111, %2, %cst_34 {dimension_numbers = #tpu.dot_dimension_numbers<[1], [0], [0], [1], [0, 0, 1, 1], [], []>} : vector<2x32xf32>, vector<32x128xf32>, vector<2x128xf32> -> vector<2x128xf32>
    %114 = arith.addf %112, %113 : vector<2x128xf32>
    %115 = vector.extract_strided_slice %114 {offsets = [0, 0], sizes = [2, 32], strides = [1, 1]} : vector<2x128xf32> to vector<2x32xf32>
    %116 = arith.negf %115 : vector<2x32xf32>
    %117 = math.exp %116 : vector<2x32xf32>
    %cst_35 = arith.constant 1.000000e+00 : f32
    %118 = vector.broadcast %cst_35 : f32 to vector<2x32xf32>
    %119 = arith.addf %118, %117 : vector<2x32xf32>
    %120 = arith.divf %118, %119 : vector<2x32xf32>
    %121 = vector.extract_strided_slice %114 {offsets = [0, 32], sizes = [2, 32], strides = [1, 1]} : vector<2x128xf32> to vector<2x32xf32>
    %122 = arith.negf %121 : vector<2x32xf32>
    %123 = math.exp %122 : vector<2x32xf32>
    %cst_36 = arith.constant 1.000000e+00 : f32
    %124 = vector.broadcast %cst_36 : f32 to vector<2x32xf32>
    %125 = arith.addf %124, %123 : vector<2x32xf32>
    %126 = arith.divf %124, %125 : vector<2x32xf32>
    %127 = vector.extract_strided_slice %114 {offsets = [0, 64], sizes = [2, 32], strides = [1, 1]} : vector<2x128xf32> to vector<2x32xf32>
    %128 = math.tanh %127 : vector<2x32xf32>
    %129 = vector.extract_strided_slice %114 {offsets = [0, 96], sizes = [2, 32], strides = [1, 1]} : vector<2x128xf32> to vector<2x32xf32>
    %130 = arith.negf %129 : vector<2x32xf32>
    %131 = math.exp %130 : vector<2x32xf32>
    %cst_37 = arith.constant 1.000000e+00 : f32
    %132 = vector.broadcast %cst_37 : f32 to vector<2x32xf32>
    %133 = arith.addf %132, %131 : vector<2x32xf32>
    %134 = arith.divf %132, %133 : vector<2x32xf32>
    %135 = arith.mulf %126, %109 : vector<2x32xf32>
    %136 = arith.mulf %120, %128 : vector<2x32xf32>
    %137 = arith.addf %135, %136 : vector<2x32xf32>
    %138 = math.tanh %137 : vector<2x32xf32>
    %139 = arith.mulf %134, %138 : vector<2x32xf32>
    %140 = vector.extract_strided_slice %21 {offsets = [2, 0], sizes = [2, 128], strides = [1, 1]} : vector<8x128xf32> to vector<2x128xf32>
    %cst_38 = arith.constant dense<0.000000e+00> : vector<2x128xf32>
    %141 = tpu.matmul %139, %2, %cst_38 {dimension_numbers = #tpu.dot_dimension_numbers<[1], [0], [0], [1], [0, 0, 1, 1], [], []>} : vector<2x32xf32>, vector<32x128xf32>, vector<2x128xf32> -> vector<2x128xf32>
    %142 = arith.addf %140, %141 : vector<2x128xf32>
    %143 = vector.extract_strided_slice %142 {offsets = [0, 0], sizes = [2, 32], strides = [1, 1]} : vector<2x128xf32> to vector<2x32xf32>
    %144 = arith.negf %143 : vector<2x32xf32>
    %145 = math.exp %144 : vector<2x32xf32>
    %cst_39 = arith.constant 1.000000e+00 : f32
    %146 = vector.broadcast %cst_39 : f32 to vector<2x32xf32>
    %147 = arith.addf %146, %145 : vector<2x32xf32>
    %148 = arith.divf %146, %147 : vector<2x32xf32>
    %149 = vector.extract_strided_slice %142 {offsets = [0, 32], sizes = [2, 32], strides = [1, 1]} : vector<2x128xf32> to vector<2x32xf32>
    %150 = arith.negf %149 : vector<2x32xf32>
    %151 = math.exp %150 : vector<2x32xf32>
    %cst_40 = arith.constant 1.000000e+00 : f32
    %152 = vector.broadcast %cst_40 : f32 to vector<2x32xf32>
    %153 = arith.addf %152, %151 : vector<2x32xf32>
    %154 = arith.divf %152, %153 : vector<2x32xf32>
    %155 = vector.extract_strided_slice %142 {offsets = [0, 64], sizes = [2, 32], strides = [1, 1]} : vector<2x128xf32> to vector<2x32xf32>
    %156 = math.tanh %155 : vector<2x32xf32>
    %157 = vector.extract_strided_slice %142 {offsets = [0, 96], sizes = [2, 32], strides = [1, 1]} : vector<2x128xf32> to vector<2x32xf32>
    %158 = arith.negf %157 : vector<2x32xf32>
    %159 = math.exp %158 : vector<2x32xf32>
    %cst_41 = arith.constant 1.000000e+00 : f32
    %160 = vector.broadcast %cst_41 : f32 to vector<2x32xf32>
    %161 = arith.addf %160, %159 : vector<2x32xf32>
    %162 = arith.divf %160, %161 : vector<2x32xf32>
    %163 = arith.mulf %154, %137 : vector<2x32xf32>
    %164 = arith.mulf %148, %156 : vector<2x32xf32>
    %165 = arith.addf %163, %164 : vector<2x32xf32>
    %166 = math.tanh %165 : vector<2x32xf32>
    %167 = arith.mulf %162, %166 : vector<2x32xf32>
    %168 = vector.extract_strided_slice %21 {offsets = [4, 0], sizes = [2, 128], strides = [1, 1]} : vector<8x128xf32> to vector<2x128xf32>
    %cst_42 = arith.constant dense<0.000000e+00> : vector<2x128xf32>
    %169 = tpu.matmul %167, %2, %cst_42 {dimension_numbers = #tpu.dot_dimension_numbers<[1], [0], [0], [1], [0, 0, 1, 1], [], []>} : vector<2x32xf32>, vector<32x128xf32>, vector<2x128xf32> -> vector<2x128xf32>
    %170 = arith.addf %168, %169 : vector<2x128xf32>
    %171 = vector.extract_strided_slice %170 {offsets = [0, 0], sizes = [2, 32], strides = [1, 1]} : vector<2x128xf32> to vector<2x32xf32>
    %172 = arith.negf %171 : vector<2x32xf32>
    %173 = math.exp %172 : vector<2x32xf32>
    %cst_43 = arith.constant 1.000000e+00 : f32
    %174 = vector.broadcast %cst_43 : f32 to vector<2x32xf32>
    %175 = arith.addf %174, %173 : vector<2x32xf32>
    %176 = arith.divf %174, %175 : vector<2x32xf32>
    %177 = vector.extract_strided_slice %170 {offsets = [0, 32], sizes = [2, 32], strides = [1, 1]} : vector<2x128xf32> to vector<2x32xf32>
    %178 = arith.negf %177 : vector<2x32xf32>
    %179 = math.exp %178 : vector<2x32xf32>
    %cst_44 = arith.constant 1.000000e+00 : f32
    %180 = vector.broadcast %cst_44 : f32 to vector<2x32xf32>
    %181 = arith.addf %180, %179 : vector<2x32xf32>
    %182 = arith.divf %180, %181 : vector<2x32xf32>
    %183 = vector.extract_strided_slice %170 {offsets = [0, 64], sizes = [2, 32], strides = [1, 1]} : vector<2x128xf32> to vector<2x32xf32>
    %184 = math.tanh %183 : vector<2x32xf32>
    %185 = vector.extract_strided_slice %170 {offsets = [0, 96], sizes = [2, 32], strides = [1, 1]} : vector<2x128xf32> to vector<2x32xf32>
    %186 = arith.negf %185 : vector<2x32xf32>
    %187 = math.exp %186 : vector<2x32xf32>
    %cst_45 = arith.constant 1.000000e+00 : f32
    %188 = vector.broadcast %cst_45 : f32 to vector<2x32xf32>
    %189 = arith.addf %188, %187 : vector<2x32xf32>
    %190 = arith.divf %188, %189 : vector<2x32xf32>
    %191 = arith.mulf %182, %165 : vector<2x32xf32>
    %192 = arith.mulf %176, %184 : vector<2x32xf32>
    %193 = arith.addf %191, %192 : vector<2x32xf32>
    %194 = math.tanh %193 : vector<2x32xf32>
    %195 = arith.mulf %190, %194 : vector<2x32xf32>
    %196 = vector.extract_strided_slice %21 {offsets = [6, 0], sizes = [2, 128], strides = [1, 1]} : vector<8x128xf32> to vector<2x128xf32>
    %cst_46 = arith.constant dense<0.000000e+00> : vector<2x128xf32>
    %197 = tpu.matmul %195, %2, %cst_46 {dimension_numbers = #tpu.dot_dimension_numbers<[1], [0], [0], [1], [0, 0, 1, 1], [], []>} : vector<2x32xf32>, vector<32x128xf32>, vector<2x128xf32> -> vector<2x128xf32>
    %198 = arith.addf %196, %197 : vector<2x128xf32>
    %199 = vector.extract_strided_slice %198 {offsets = [0, 0], sizes = [2, 32], strides = [1, 1]} : vector<2x128xf32> to vector<2x32xf32>
    %200 = arith.negf %199 : vector<2x32xf32>
    %201 = math.exp %200 : vector<2x32xf32>
    %cst_47 = arith.constant 1.000000e+00 : f32
    %202 = vector.broadcast %cst_47 : f32 to vector<2x32xf32>
    %203 = arith.addf %202, %201 : vector<2x32xf32>
    %204 = arith.divf %202, %203 : vector<2x32xf32>
    %205 = vector.extract_strided_slice %198 {offsets = [0, 32], sizes = [2, 32], strides = [1, 1]} : vector<2x128xf32> to vector<2x32xf32>
    %206 = arith.negf %205 : vector<2x32xf32>
    %207 = math.exp %206 : vector<2x32xf32>
    %cst_48 = arith.constant 1.000000e+00 : f32
    %208 = vector.broadcast %cst_48 : f32 to vector<2x32xf32>
    %209 = arith.addf %208, %207 : vector<2x32xf32>
    %210 = arith.divf %208, %209 : vector<2x32xf32>
    %211 = vector.extract_strided_slice %198 {offsets = [0, 64], sizes = [2, 32], strides = [1, 1]} : vector<2x128xf32> to vector<2x32xf32>
    %212 = math.tanh %211 : vector<2x32xf32>
    %213 = vector.extract_strided_slice %198 {offsets = [0, 96], sizes = [2, 32], strides = [1, 1]} : vector<2x128xf32> to vector<2x32xf32>
    %214 = arith.negf %213 : vector<2x32xf32>
    %215 = math.exp %214 : vector<2x32xf32>
    %cst_49 = arith.constant 1.000000e+00 : f32
    %216 = vector.broadcast %cst_49 : f32 to vector<2x32xf32>
    %217 = arith.addf %216, %215 : vector<2x32xf32>
    %218 = arith.divf %216, %217 : vector<2x32xf32>
    %219 = arith.mulf %210, %193 : vector<2x32xf32>
    %220 = arith.mulf %204, %212 : vector<2x32xf32>
    %221 = arith.addf %219, %220 : vector<2x32xf32>
    %222 = math.tanh %221 : vector<2x32xf32>
    %223 = arith.mulf %218, %222 : vector<2x32xf32>
    %224 = tpu.concatenate %55, %83, %111, %139, %167, %195, %223 in 0 : vector<2x32xf32>, vector<2x32xf32>, vector<2x32xf32>, vector<2x32xf32>, vector<2x32xf32>, vector<2x32xf32>, vector<2x32xf32> -> vector<14x32xf32>
    %cst_50 = arith.constant dense<0.000000e+00> : vector<14x8xf32>
    %225 = tpu.matmul %224, %7, %cst_50 {dimension_numbers = #tpu.dot_dimension_numbers<[1], [0], [0], [1], [0, 0, 1, 1], [], []>} : vector<14x32xf32>, vector<32x8xf32>, vector<14x8xf32> -> vector<14x8xf32>
    %226 = vector.broadcast %8 : vector<1x8xf32> to vector<14x8xf32>
    %227 = arith.addf %225, %226 : vector<14x8xf32>
    %c0_51 = arith.constant 0 : index
    %c0_52 = arith.constant 0 : index
    %228 = vector.load %arg5[%c0_51, %c0_52] : memref<14x8xf32, #tpu.memory_space<vmem>>, vector<14x8xf32>
    tpu.vector_store %arg5[%c0_51, %c0_52], %227 {strides = array<i32>} : memref<14x8xf32, #tpu.memory_space<vmem>>, vector<14x8xf32>,
    return
  }
}

</mosaic_0001>

<bundles_post_ra>
// kernel: nelson_forward.1
= control target key start
LH: loop header
LB: loop body
LE: loop exit
PB: predicated region body
PF: predicated region fallthrough
CT: control target
= control target key end

     0   :  { %vm105_vm0 = vcmask 146432   ;;  %vm298_vm1 = vcmask 1041408   ;;  %vm2476_vm2 = vmmov 0   ;;  %vm751_vm3 = vcmask 64512   ;;  %s2478_s20 = smov 64   ;;  %s2479_s23 = smov 32   ;;  %s3114_s4 = inlined_call_operand.vmem [shape: f32[72,8], index: 4, kind: input, shape index: {}]   ;;  %s3115_s0 = inlined_call_operand.vmem [shape: f32[512,18], index: 0, kind: input, shape index: {}]   ;;  %s3116_s3 = inlined_call_operand.vmem [shape: f32[56,128], index: 3, kind: input, shape index: {}]   ;;  %s3117_s1 = inlined_call_operand.vmem [shape: f32[6,8], index: 1, kind: input, shape index: {}]   ;;  %s3118_s2 = inlined_call_operand.vmem [shape: f32[4,32], index: 2, kind: input, shape index: {}]   ;;  %s3119_s5 = inlined_call_operand.vmem [shape: f32[14,8], index: 5, kind: output, shape index: {}]  }
   0x1   :  { %v28_v0 = vld [vmem:[%s3114_s4] sm:$0xff]  ;;  %v29_v1 = vld [vmem:[%s3114_s4 + $0x8] sm:$0xff]  ;;  %v30_v4 = vld [vmem:[%s3114_s4 + $0x10] sm:$0x3]  ;;  %vm940_vm4 = vcmask 1041409   ;;  %vm942_vm5 = vcmask 1042434  }
   0x2   :  { %v2356_v2 = vpack.c.bf16 %v29_v1, %v28_v0  ;;  %v37_v3 = vld [vmem:[%s3115_s0] sm:$0xff]  ;;  %v38_v5 = vld [vmem:[%s3115_s0 + $0x8] sm:$0xff]  ;;  %v39_v6 = vld [vmem:[%s3115_s0 + $0x10] sm:$0xff]  ;;  %vm944_vm6 = vcmask 1043459   ;;  %vm946_vm7 = vcmask 1044484   ;;  %vm948_vm8 = vcmask 1045509  }
   0x3   :  { %2162 = vmatprep.mubr.msk.f32.mxu0 %vm105_vm0, %v37_v3  ;;  %v40_v7 = vld [vmem:[%s3115_s0 + $0x18] sm:$0xff]  ;;  %v41_v8 = vld [vmem:[%s3115_s0 + $0x20] sm:$0xff]  ;;  %v42_v9 = vld [vmem:[%s3115_s0 + $0x28] sm:$0xff]  ;;  %vm950_vm9 = vcmask 1046534   ;;  %vm952_vm10 = vcmask 1047559   ;;  %vm1106_vm11 = vcmask 261120  }
   0x4   :  { %2357 = vmatprep.subr.bf16.mxu0 %v2356_v2  ;;  %2410 = vmatprep.subr.bf16.mxu1 %v2356_v2  ;;  %v87_v10 = vld [vmem:[%s3115_s0 + $0x190] sm:$0xff]  ;;  %v88_v11 = vld [vmem:[%s3115_s0 + $0x198] sm:$0xff]  ;;  %v89_v13 = vld [vmem:[%s3115_s0 + $0x1a0] sm:$0xff]  ;;  %vm1855_vm12 = vcmask 1043456   ;;  %vm1857_vm13 = vcmask 1045504   ;;  %vm1951_vm14 = vcmask 62464  }
   0x5   :  { %2359 = vmatpush3.bf16.msra.mxu0 %v2356_v2  ;;  %2412 = vmatpush3.bf16.msra.mxu1 %v2356_v2  ;;  %v43_v12 = vld [vmem:[%s3115_s0 + $0x30] sm:$0xff]  ;;  %v90_v14 = vld [vmem:[%s3115_s0 + $0x1a8] sm:$0xff]  ;;  %v44_v15 = vld [vmem:[%s3115_s0 + $0x38] sm:$0xff] }
   0x6   :  { %2160 = vmatprep.subr.msk.mxu0 %vm298_vm1, %v30_v4  ;;  %2411 = vmatprep.subr.msk.mxu1 %vm298_vm1, %v30_v4  ;;  %v91_v16 = vld [vmem:[%s3115_s0 + $0x1b0] sm:$0xff]  ;;  %v45_v17 = vld [vmem:[%s3115_s0 + $0x40] sm:$0xff]  ;;  %v92_v18 = vld [vmem:[%s3115_s0 + $0x1b8] sm:$0xff] }
   0x7   :  { %2237 = vmatprep.mubr.msk.f32.mxu1 %vm105_vm0, %v87_v10  ;;  %v46_v19 = vld [vmem:[%s3115_s0 + $0x48] sm:$0xff]  ;;  %v93_v20 = vld [vmem:[%s3115_s0 + $0x1c0] sm:$0xff]  ;;  %v47_v21 = vld [vmem:[%s3115_s0 + $0x50] sm:$0xff] }
   0x8   :  { %v94_v22 = vld [vmem:[%s3115_s0 + $0x1c8] sm:$0xff]  ;;  %v48_v23 = vld [vmem:[%s3115_s0 + $0x58] sm:$0xff]  ;;  %v95_v24 = vld [vmem:[%s3115_s0 + $0x1d0] sm:$0xff] }
   0x9   :  { %2161 = vmatpush3.msk.msra.mxu0 %vm298_vm1, %v30_v4  ;;  %2413 = vmatpush3.msk.msra.mxu1 %vm298_vm1, %v30_v4  ;;  %v49_v25 = vld [vmem:[%s3115_s0 + $0x60] sm:$0xff]  ;;  %v96_v26 = vld [vmem:[%s3115_s0 + $0x1d8] sm:$0xff]  ;;  %v50_v27 = vld [vmem:[%s3115_s0 + $0x68] sm:$0xff]  ;;  %v2475_v4 = vmov 0.0  }
   0xa   :  { %2163 = vmatmul.mubr.msk.f32.vlgmr.msra.gmra.mrb[0].mxu0 %vm105_vm0, %v38_v5  ;;  %2238 = vmatmul.mubr.msk.f32.vlgmr.msra.gmra.mrb[0].mxu1 %vm105_vm0, %v88_v11  ;;  %v97_v28 = vld [vmem:[%s3115_s0 + $0x1e0] sm:$0xff]  ;;  %v51_v29 = vld [vmem:[%s3115_s0 + $0x70] sm:$0xff]  ;;  %v98_v30 = vld [vmem:[%s3115_s0 + $0x1e8] sm:$0xff] }
   0xb   :  { %2165 = vmatprep.mubr.msk.f32.mxu0 %vm105_vm0, %v39_v6  ;;  %2240 = vmatprep.mubr.msk.f32.mxu1 %vm105_vm0, %v89_v13  ;;  %v52_v31 = vld [vmem:[%s3115_s0 + $0x78] sm:$0xff]  ;;  %v99_v32 = vld [vmem:[%s3115_s0 + $0x1f0] sm:$0xff]  ;;  %v53_v33 = vld [vmem:[%s3115_s0 + $0x80] sm:$0xff] }
   0xc   :  { %v100_v34 = vld [vmem:[%s3115_s0 + $0x1f8] sm:$0xff]  ;;  %v54_v35 = vld [vmem:[%s3115_s0 + $0x88] sm:$0xff]  ;;  %v55_v36 = vld [vmem:[%s3115_s0 + $0x90] sm:$0xff]  ;;  %2258 = vmatprep.subr.mxu1 %v2475_v4 }
   0xd   :  { %v56_v37 = vld [vmem:[%s3115_s0 + $0x98] sm:$0xff]  ;;  %v57_v38 = vld [vmem:[%s3115_s0 + $0xa0] sm:$0xff]  ;;  %v58_v39 = vld [vmem:[%s3115_s0 + $0xa8] sm:$0xff] }
   0xe   :  { %2166 = vmatmul.mubr.msk.f32.gmra.mrb[2].mxu0 %vm105_vm0, %v40_v7  ;;  %2241 = vmatmul.mubr.msk.f32.gmra.mrb[2].mxu1 %vm105_vm0, %v90_v14  ;;  %v59_v40 = vld [vmem:[%s3115_s0 + $0xb0] sm:$0xff]  ;;  %v60_v41 = vld [vmem:[%s3115_s0 + $0xb8] sm:$0xff]  ;;  %v61_v42 = vld [vmem:[%s3115_s0 + $0xc0] sm:$0xff] }
   0xf   :  { %2168 = vmatprep.mubr.msk.f32.mxu0 %vm105_vm0, %v41_v8  ;;  %2243 = vmatprep.mubr.msk.f32.mxu1 %vm105_vm0, %v91_v16  ;;  %v62_v43 = vld [vmem:[%s3115_s0 + $0xc8] sm:$0xff]  ;;  %v63_v44 = vld [vmem:[%s3115_s0 + $0xd0] sm:$0xff]  ;;  %v64_v45 = vld [vmem:[%s3115_s0 + $0xd8] sm:$0xff] }
  0x10   :  { %v65_v46 = vld [vmem:[%s3115_s0 + $0xe0] sm:$0xff]  ;;  %v66_v47 = vld [vmem:[%s3115_s0 + $0xe8] sm:$0xff]  ;;  %v67_v48 = vld [vmem:[%s3115_s0 + $0xf0] sm:$0xff] }
  0x11   :  { %v68_v49 = vld [vmem:[%s3115_s0 + $0xf8] sm:$0xff]  ;;  %v69_v50 = vld [vmem:[%s3115_s0 + $0x100] sm:$0xff]  ;;  %v70_v51 = vld [vmem:[%s3115_s0 + $0x108] sm:$0xff] }
  0x12   :  { %2169 = vmatmul.mubr.msk.f32.gmra.mrb[4].mxu0 %vm105_vm0, %v42_v9  ;;  %2244 = vmatmul.mubr.msk.f32.gmra.mrb[4].mxu1 %vm105_vm0, %v92_v18  ;;  %v71_v52 = vld [vmem:[%s3115_s0 + $0x110] sm:$0xff]  ;;  %v72_v53 = vld [vmem:[%s3115_s0 + $0x118] sm:$0xff]  ;;  %v73_v54 = vld [vmem:[%s3115_s0 + $0x120] sm:$0xff] }
  0x13   :  { %2171 = vmatprep.mubr.msk.f32.mxu0 %vm105_vm0, %v43_v12  ;;  %2246 = vmatprep.mubr.msk.f32.mxu1 %vm105_vm0, %v93_v20  ;;  %v74_v55 = vld [vmem:[%s3115_s0 + $0x128] sm:$0xff]  ;;  %v75_v56 = vld [vmem:[%s3115_s0 + $0x130] sm:$0xff]  ;;  %v76_v57 = vld [vmem:[%s3115_s0 + $0x138] sm:$0xff] }
  0x14   :  { %v77_v58 = vld [vmem:[%s3115_s0 + $0x140] sm:$0xff]  ;;  %v78_v59 = vld [vmem:[%s3115_s0 + $0x148] sm:$0xff]  ;;  %v79_v60 = vld [vmem:[%s3115_s0 + $0x150] sm:$0xff] }
  0x15   :  { %v80_v61 = vld [vmem:[%s3115_s0 + $0x158] sm:$0xff]  ;;  %v81_v62 = vld [vmem:[%s3115_s0 + $0x160] sm:$0xff]  ;;  %v82_v63 = vld [vmem:[%s3115_s0 + $0x168] sm:$0xff] }
  0x16   :  { %2172 = vmatmul.mubr.msk.f32.gmra.mrb[6].mxu0 %vm105_vm0, %v44_v15  ;;  %2247 = vmatmul.mubr.msk.f32.gmra.mrb[6].mxu1 %vm105_vm0, %v94_v22  ;;  %v83_v0 = vld [vmem:[%s3115_s0 + $0x170] sm:$0xff]  ;;  %v84_v1 = vld [vmem:[%s3115_s0 + $0x178] sm:$0xff]  ;;  %v85_v2 = vld [vmem:[%s3115_s0 + $0x180] sm:$0xff] }
  0x17   :  { %2174 = vmatprep.mubr.msk.f32.mxu0 %vm105_vm0, %v45_v17  ;;  %2249 = vmatprep.mubr.msk.f32.mxu1 %vm105_vm0, %v95_v24  ;;  %v86_v3 = vld [vmem:[%s3115_s0 + $0x188] sm:$0xff]  ;;  %v2789_v6 = vld [vmem:[%s3114_s4 + $0x18] ss:$0 sm:$0xff] }
  0x18   :  { %v21_v5 = vld [vmem:[%s3116_s3 + $0x8] sm:$0xff] }
  0x19   :  { %2259 = vmatpush3.msra.mxu1 %v21_v5 }
  0x1a   :  { %2175 = vmatmul.mubr.msk.f32.gmra.mrb[8].mxu0 %vm105_vm0, %v46_v19  ;;  %2250 = vmatmul.mubr.msk.f32.gmra.mrb[8].mxu1 %vm105_vm0, %v96_v26 }
  0x1b   :  { %2177 = vmatprep.mubr.msk.f32.mxu0 %vm105_vm0, %v47_v21  ;;  %2252 = vmatprep.mubr.msk.f32.mxu1 %vm105_vm0, %v97_v28 }
  0x1c   :  { %2263 = vmatprep.subr.mxu1 %v2475_v4 }
  0x1e   :  { %2178 = vmatmul.mubr.msk.f32.gmra.mrb[10].mxu0 %vm105_vm0, %v48_v23  ;;  %2253 = vmatmul.mubr.msk.f32.gmra.mrb[10].mxu1 %vm105_vm0, %v98_v30 }
  0x1f   :  { %2180 = vmatprep.mubr.msk.f32.mxu0 %vm105_vm0, %v49_v25  ;;  %2255 = vmatprep.mubr.msk.f32.mxu1 %vm105_vm0, %v99_v32 }
  0x22   :  { %2181 = vmatmul.mubr.msk.f32.gmra.mrb[12].mxu0 %vm105_vm0, %v50_v27  ;;  %2256 = vmatmul.mubr.msk.f32.gmra.mrb[12].mxu1 %vm105_vm0, %v100_v34 }
  0x23   :  { %2183 = vmatprep.mubr.msk.f32.mxu0 %vm105_vm0, %v51_v29  ;;  %2260 = vmatprep.mubr.msk.f32.mxu1 %vm2476_vm2, %v2475_v4 }
  0x26   :  { %2184 = vmatmul.mubr.msk.f32.gmra.mrb[14].mxu0 %vm105_vm0, %v52_v31 }
  0x27   :  { %2186 = vmatprep.mubr.msk.f32.mxu0 %vm105_vm0, %v53_v33 }
  0x2a   :  { %2187 = vmatmul.mubr.msk.f32.gmra.mrb[16].mxu0 %vm105_vm0, %v54_v35 }
  0x2b   :  { %2189 = vmatprep.mubr.msk.f32.mxu0 %vm105_vm0, %v55_v36 }
  0x2e   :  { %2190 = vmatmul.mubr.msk.f32.gmra.mrb[18].mxu0 %vm105_vm0, %v56_v37 }
  0x2f   :  { %2192 = vmatprep.mubr.msk.f32.mxu0 %vm105_vm0, %v57_v38 }
  0x32   :  { %2193 = vmatmul.mubr.msk.f32.gmra.mrb[20].mxu0 %vm105_vm0, %v58_v39 }
  0x33   :  { %2195 = vmatprep.mubr.msk.f32.mxu0 %vm105_vm0, %v59_v40 }
  0x36   :  { %2196 = vmatmul.mubr.msk.f32.gmra.mrb[22].mxu0 %vm105_vm0, %v60_v41 }
  0x37   :  { %2198 = vmatprep.mubr.msk.f32.mxu0 %vm105_vm0, %v61_v42 }
  0x3a   :  { %2199 = vmatmul.mubr.msk.f32.gmra.mrb[24].mxu0 %vm105_vm0, %v62_v43 }
  0x3b   :  { %2201 = vmatprep.mubr.msk.f32.mxu0 %vm105_vm0, %v63_v44 }
  0x3e   :  { %2202 = vmatmul.mubr.msk.f32.gmra.mrb[26].mxu0 %vm105_vm0, %v64_v45 }
  0x3f   :  { %2204 = vmatprep.mubr.msk.f32.mxu0 %vm105_vm0, %v65_v46 }
  0x42   :  { %2205 = vmatmul.mubr.msk.f32.gmra.mrb[28].mxu0 %vm105_vm0, %v66_v47 }
  0x43   :  { %2207 = vmatprep.mubr.msk.f32.mxu0 %vm105_vm0, %v67_v48 }
  0x46   :  { %2208 = vmatmul.mubr.msk.f32.gmra.mrb[30].mxu0 %vm105_vm0, %v68_v49 }
  0x47   :  { %2210 = vmatprep.mubr.msk.f32.mxu0 %vm105_vm0, %v69_v50 }
  0x4a   :  { %2211 = vmatmul.mubr.msk.f32.gmra.mrb[32].mxu0 %vm105_vm0, %v70_v51 }
  0x4b   :  { %2213 = vmatprep.mubr.msk.f32.mxu0 %vm105_vm0, %v71_v52 }
  0x4e   :  { %2214 = vmatmul.mubr.msk.f32.gmra.mrb[34].mxu0 %vm105_vm0, %v72_v53 }
  0x4f   :  { %2216 = vmatprep.mubr.msk.f32.mxu0 %vm105_vm0, %v73_v54 }
  0x52   :  { %2217 = vmatmul.mubr.msk.f32.gmra.mrb[36].mxu0 %vm105_vm0, %v74_v55 }
  0x53   :  { %2219 = vmatprep.mubr.msk.f32.mxu0 %vm105_vm0, %v75_v56 }
  0x56   :  { %2220 = vmatmul.mubr.msk.f32.gmra.mrb[38].mxu0 %vm105_vm0, %v76_v57 }
  0x57   :  { %2222 = vmatprep.mubr.msk.f32.mxu0 %vm105_vm0, %v77_v58 }
  0x5a   :  { %2223 = vmatmul.mubr.msk.f32.gmra.mrb[40].mxu0 %vm105_vm0, %v78_v59 }
  0x5b   :  { %2225 = vmatprep.mubr.msk.f32.mxu0 %vm105_vm0, %v79_v60 }
  0x5e   :  { %2226 = vmatmul.mubr.msk.f32.gmra.mrb[42].mxu0 %vm105_vm0, %v80_v61 }
  0x5f   :  { %2228 = vmatprep.mubr.msk.f32.mxu0 %vm105_vm0, %v81_v62 }
  0x62   :  { %2229 = vmatmul.mubr.msk.f32.gmra.mrb[44].mxu0 %vm105_vm0, %v82_v63 }
  0x63   :  { %2231 = vmatprep.mubr.msk.f32.mxu0 %vm105_vm0, %v83_v0 }
  0x66   :  { %2232 = vmatmul.mubr.msk.f32.gmra.mrb[46].mxu0 %vm105_vm0, %v84_v1 }
  0x67   :  { %2234 = vmatprep.mubr.msk.f32.mxu0 %vm105_vm0, %v85_v2 }
  0x6a   :  { %2235 = vmatmul.mubr.msk.f32.gmra.mrb[48].mxu0 %vm105_vm0, %v86_v3 }
  0xdd   :  { %v2164_v7 = vpop.f32.mrb[0].mxu0  ;;  %v2797_v20 = vpop.f32.mrb[0].mxu1 }
  0xde   :  { %v374_v8 = vadd.f32 %v2164_v7, %v2789_v6  ;;  %v368_v9 = vpop.f32.mrb[1].mxu0  ;;  %v2799_v24 = vpop.f32.mrb[1].mxu1 }
  0xdf   :  { %v369_v10 = vadd.f32 %v2789_v6, %v368_v9 }
  0xe0   :  { %v688_v11 = vmax.f32 %v374_v8, 0.0 }
  0xe1   :  { %v687_v12 = vmax.f32 %v369_v10, 0.0  ;;  %v2167_v13 = vpop.f32.mrb[2].mxu0  ;;  %v2804_v30 = vpop.f32.mrb[2].mxu1 }
  0xe2   :  { %v753_v14 = vsel %vm751_vm3, %v688_v11, 0.0  ;;  %v384_v15 = vadd.f32 %v2167_v13, %v2789_v6  ;;  %v378_v16 = vpop.f32.mrb[3].mxu0  ;;  %v2807_v35 = vpop.f32.mrb[3].mxu1 }
  0xe3   :  { %v752_v17 = vsel %vm751_vm3, %v687_v12, 0.0  ;;  %v379_v18 = vadd.f32 %v2789_v6, %v378_v16 }
  0xe4   :  { %v754_v19 = vadd.f32 %v753_v14, %v752_v17  ;;  %v690_v21 = vmax.f32 %v384_v15, 0.0 }
  0xe5   :  { %v689_v22 = vmax.f32 %v379_v18, 0.0  ;;  %v2170_v23 = vpop.f32.mrb[4].mxu0  ;;  %v2812_v42 = vpop.f32.mrb[4].mxu1 }
  0xe6   :  { %v394_v25 = vadd.f32 %v2170_v23, %v2789_v6  ;;  %v388_v26 = vpop.f32.mrb[5].mxu0  ;;  %v757_v31 = vsel %vm751_vm3, %v690_v21, 0.0  ;;  %v2815_v47 = vpop.f32.mrb[5].mxu1 }
  0xe7   :  { %v755_v27 = vsel %vm751_vm3, %v689_v22, 0.0  ;;  %v389_v28 = vadd.f32 %v2789_v6, %v388_v26 }
  0xe8   :  { %v756_v29 = vadd.f32 %v755_v27, %v754_v19  ;;  %v692_v32 = vmax.f32 %v394_v25, 0.0 }
  0xe9   :  { %v691_v33 = vmax.f32 %v389_v28, 0.0  ;;  %v2173_v34 = vpop.f32.mrb[6].mxu0  ;;  %v2248_v55 = vpop.f32.mrb[6].mxu1 }
  0xea   :  { %v758_v36 = vadd.f32 %v757_v31, %v756_v29  ;;  %v404_v37 = vadd.f32 %v2173_v34, %v2789_v6  ;;  %v398_v38 = vpop.f32.mrb[7].mxu0  ;;  %v761_v43 = vsel %vm751_vm3, %v692_v32, 0.0  ;;  %v654_v59 = vadd.f32 %v2248_v55, %v2789_v6  ;;  %v648_v60 = vpop.f32.mrb[7].mxu1 }
  0xeb   :  { %v759_v39 = vsel %vm751_vm3, %v691_v33, 0.0  ;;  %v399_v40 = vadd.f32 %v2789_v6, %v398_v38  ;;  %v649_v5 = vadd.f32 %v2789_v6, %v648_v60 }
  0xec   :  { %v760_v41 = vadd.f32 %v759_v39, %v758_v36  ;;  %v694_v44 = vmax.f32 %v404_v37, 0.0  ;;  %v744_v3 = vmax.f32 %v654_v59, 0.0 }
  0xed   :  { %v693_v45 = vmax.f32 %v399_v40, 0.0  ;;  %v2176_v46 = vpop.f32.mrb[8].mxu0  ;;  %v2251_v9 = vpop.f32.mrb[8].mxu1  ;;  %v743_v13 = vmax.f32 %v649_v5, 0.0 }
  0xee   :  { %v762_v48 = vadd.f32 %v761_v43, %v760_v41  ;;  %v414_v49 = vadd.f32 %v2176_v46, %v2789_v6  ;;  %v408_v50 = vpop.f32.mrb[9].mxu0  ;;  %v765_v56 = vsel %vm751_vm3, %v694_v44, 0.0  ;;  %v900_v12 = vsel %vm751_vm3, %v744_v3, 0.0  ;;  %v658_v15 = vpop.f32.mrb[9].mxu1 }
  0xef   :  { %v763_v51 = vsel %vm751_vm3, %v693_v45, 0.0  ;;  %v409_v52 = vadd.f32 %v2789_v6, %v408_v50  ;;  %v664_v14 = vadd.f32 %v2251_v9, %v2789_v6  ;;  %v659_v19 = vadd.f32 %v2789_v6, %v658_v15 }
  0xf0   :  { %v764_v53 = vadd.f32 %v763_v51, %v762_v48  ;;  %v696_v54 = vmax.f32 %v414_v49, 0.0  ;;  %v899_v23 = vsel %vm751_vm3, %v743_v13, 0.0 }
  0xf1   :  { %v695_v57 = vmax.f32 %v409_v52, 0.0  ;;  %v2179_v58 = vpop.f32.mrb[10].mxu0  ;;  %v746_v25 = vmax.f32 %v664_v14, 0.0  ;;  %v901_v28 = vadd.f32 %v900_v12, %v899_v23  ;;  %v2254_v29 = vpop.f32.mrb[10].mxu1  ;;  %v745_v34 = vmax.f32 %v659_v19, 0.0 }
  0xf2   :  { %v766_v61 = vadd.f32 %v765_v56, %v764_v53  ;;  %v774_v62 = vsel %vm751_vm3, %v696_v54, 0.0  ;;  %v424_v63 = vadd.f32 %v2179_v58, %v2789_v6  ;;  %v418_v0 = vpop.f32.mrb[11].mxu0  ;;  %v674_v36 = vadd.f32 %v2254_v29, %v2789_v6  ;;  %v668_v37 = vpop.f32.mrb[11].mxu1 }
  0xf3   :  { %v773_v1 = vsel %vm751_vm3, %v695_v57, 0.0  ;;  %v419_v2 = vadd.f32 %v2789_v6, %v418_v0  ;;  %v904_v45 = vsel %vm751_vm3, %v746_v25, 0.0  ;;  %v902_v46 = vsel %vm751_vm3, %v745_v34, 0.0 }
  0xf4   :  { %v775_v7 = vadd.f32 %v774_v62, %v773_v1  ;;  %v698_v8 = vmax.f32 %v424_v63, 0.0  ;;  %v767_v16 = vrot.slane %v766_v61, 4  ;;  %v903_v50 = vadd.f32 %v902_v46, %v901_v28 }
  0xf5   :  { %v697_v10 = vmax.f32 %v419_v2, 0.0  ;;  %v2182_v11 = vpop.f32.mrb[12].mxu0  ;;  %v748_v51 = vmax.f32 %v674_v36, 0.0  ;;  %v2257_v52 = vpop.f32.mrb[12].mxu1  ;;  %v669_v56 = vadd.f32 %v2789_v6, %v668_v37 }
  0xf6   :  { %v434_v17 = vadd.f32 %v2182_v11, %v2789_v6  ;;  %v428_v18 = vpop.f32.mrb[13].mxu0  ;;  %v778_v26 = vsel %vm751_vm3, %v698_v8, 0.0  ;;  %v768_v38 = vadd.f32 %v767_v16, %v766_v61  ;;  %v684_v57 = vadd.f32 %v2257_v52, %v2789_v6  ;;  %v678_v58 = vpop.f32.mrb[13].mxu1 }
  0xf7   :  { %v776_v21 = vsel %vm751_vm3, %v697_v10, 0.0  ;;  %v429_v22 = vadd.f32 %v2789_v6, %v428_v18  ;;  %v747_v1 = vmax.f32 %v669_v56, 0.0  ;;  %v905_v2 = vadd.f32 %v904_v45, %v903_v50 }
  0xf8   :  { %v777_v27 = vadd.f32 %v776_v21, %v775_v7  ;;  %v700_v31 = vmax.f32 %v434_v17, 0.0  ;;  %v769_v59 = vrot.slane %v768_v38, 2  ;;  %v908_v8 = vsel %vm751_vm3, %v748_v51, 0.0 }
  0xf9   :  { %v699_v32 = vmax.f32 %v429_v22, 0.0  ;;  %v2185_v33 = vpop.f32.mrb[14].mxu0  ;;  %v906_v11 = vsel %vm751_vm3, %v747_v1, 0.0  ;;  %v750_v12 = vmax.f32 %v684_v57, 0.0  ;;  %v679_v13 = vadd.f32 %v2789_v6, %v678_v58 }
  0xfa   :  { %v779_v39 = vadd.f32 %v778_v26, %v777_v27  ;;  %v444_v40 = vadd.f32 %v2185_v33, %v2789_v6  ;;  %v438_v41 = vpop.f32.mrb[15].mxu0  ;;  %v782_v53 = vsel %vm751_vm3, %v700_v31, 0.0  ;;  %v907_v18 = vadd.f32 %v906_v11, %v905_v2 }
  0xfb   :  { %v780_v43 = vsel %vm751_vm3, %v699_v32, 0.0  ;;  %v439_v44 = vadd.f32 %v2789_v6, %v438_v41  ;;  %v749_v22 = vmax.f32 %v679_v13, 0.0  ;;  %v770_v23 = vadd.f32 %v769_v59, %v768_v38 }
  0xfc   :  { %v781_v48 = vadd.f32 %v780_v43, %v779_v39  ;;  %v702_v49 = vmax.f32 %v444_v40, 0.0  ;;  %v909_v27 = vadd.f32 %v908_v8, %v907_v18  ;;  %v912_v32 = vsel %vm751_vm3, %v750_v12, 0.0 }
  0xfd   :  { %v701_v54 = vmax.f32 %v439_v44, 0.0  ;;  %v2188_v55 = vpop.f32.mrb[16].mxu0  ;;  %v910_v33 = vsel %vm751_vm3, %v749_v22, 0.0  ;;  %v771_v38 = vrot.slane %v770_v23, 1 }
  0xfe   :  { %v783_v60 = vadd.f32 %v782_v53, %v781_v48  ;;  %v454_v61 = vadd.f32 %v2188_v55, %v2789_v6  ;;  %v448_v62 = vpop.f32.mrb[17].mxu0  ;;  %v786_v3 = vsel %vm751_vm3, %v702_v49, 0.0  ;;  %v911_v39 = vadd.f32 %v910_v33, %v909_v27 }
  0xff   :  { %v784_v63 = vsel %vm751_vm3, %v701_v54, 0.0  ;;  %v449_v0 = vadd.f32 %v2789_v6, %v448_v62  ;;  %v772_v57 = vadd.f32 %v771_v38, %v770_v23 }
 0x100   :  { %v785_v5 = vadd.f32 %v784_v63, %v783_v60  ;;  %v704_v7 = vmax.f32 %v454_v61, 0.0  ;;  %v2860_v45 = vadd.f32 %v912_v32, %v911_v39 }
 0x101   :  { %v703_v9 = vmax.f32 %v449_v0, 0.0  ;;  %v2191_v10 = vpop.f32.mrb[18].mxu0  ;;  %v920_v8 = vmul.f32 0.015625, %v772_v57 }
 0x102   :  { %v787_v14 = vadd.f32 %v786_v3, %v785_v5  ;;  %v795_v15 = vsel %vm751_vm3, %v704_v7, 0.0  ;;  %v464_v16 = vadd.f32 %v2191_v10, %v2789_v6  ;;  %v458_v17 = vpop.f32.mrb[19].mxu0 }
 0x103   :  { %v794_v19 = vsel %vm751_vm3, %v703_v9, 0.0  ;;  %v459_v21 = vadd.f32 %v2789_v6, %v458_v17 }
 0x104   :  { %v788_v25 = vrot.slane %v787_v14, 4  ;;  %v796_v26 = vadd.f32 %v795_v15, %v794_v19  ;;  %v706_v28 = vmax.f32 %v464_v16, 0.0 }
 0x105   :  { %v705_v29 = vmax.f32 %v459_v21, 0.0  ;;  %v2194_v31 = vpop.f32.mrb[20].mxu0 }
 0x106   :  { %v789_v34 = vadd.f32 %v788_v25, %v787_v14  ;;  %v474_v36 = vadd.f32 %v2194_v31, %v2789_v6  ;;  %v468_v37 = vpop.f32.mrb[21].mxu0  ;;  %v799_v46 = vsel %vm751_vm3, %v706_v28, 0.0 }
 0x107   :  { %v797_v40 = vsel %vm751_vm3, %v705_v29, 0.0  ;;  %v469_v41 = vadd.f32 %v2789_v6, %v468_v37 }
 0x108   :  { %v790_v43 = vrot.slane %v789_v34, 2  ;;  %v798_v44 = vadd.f32 %v797_v40, %v796_v26  ;;  %v708_v48 = vmax.f32 %v474_v36, 0.0 }
 0x109   :  { %v707_v49 = vmax.f32 %v469_v41, 0.0  ;;  %v2197_v50 = vpop.f32.mrb[22].mxu0 }
 0x10a   :  { %v791_v51 = vadd.f32 %v790_v43, %v789_v34  ;;  %v800_v52 = vadd.f32 %v799_v46, %v798_v44  ;;  %v484_v53 = vadd.f32 %v2197_v50, %v2789_v6  ;;  %v478_v54 = vpop.f32.mrb[23].mxu0  ;;  %v803_v60 = vsel %vm751_vm3, %v708_v48, 0.0 }
 0x10b   :  { %v801_v55 = vsel %vm751_vm3, %v707_v49, 0.0  ;;  %v479_v56 = vadd.f32 %v2789_v6, %v478_v54 }
 0x10c   :  { %v792_v58 = vrot.slane %v791_v51, 1  ;;  %v802_v59 = vadd.f32 %v801_v55, %v800_v52  ;;  %v710_v61 = vmax.f32 %v484_v53, 0.0 }
 0x10d   :  { %v709_v62 = vmax.f32 %v479_v56, 0.0  ;;  %v2200_v63 = vpop.f32.mrb[24].mxu0 }
 0x10e   :  { %v793_v0 = vadd.f32 %v792_v58, %v791_v51  ;;  %v804_v1 = vadd.f32 %v803_v60, %v802_v59  ;;  %v494_v2 = vadd.f32 %v2200_v63, %v2789_v6  ;;  %v488_v3 = vpop.f32.mrb[25].mxu0  ;;  %v807_v12 = vsel %vm751_vm3, %v710_v61, 0.0 }
 0x10f   :  { %v805_v5 = vsel %vm751_vm3, %v709_v62, 0.0  ;;  %v489_v7 = vadd.f32 %v2789_v6, %v488_v3 }
 0x110   :  { %v921_v9 = vmul.f32 0.015625, %v793_v0  ;;  %v806_v10 = vadd.f32 %v805_v5, %v804_v1  ;;  %v712_v11 = vmax.f32 %v494_v2, 0.0 }
 0x111   :  { %v711_v13 = vmax.f32 %v489_v7, 0.0  ;;  %v2203_v14 = vpop.f32.mrb[26].mxu0 }
 0x112   :  { %v941_v15 = vsel %vm940_vm4, %v921_v9, %v920_v8  ;;  %v808_v16 = vadd.f32 %v807_v12, %v806_v10  ;;  %v816_v17 = vsel %vm751_vm3, %v712_v11, 0.0  ;;  %v504_v18 = vadd.f32 %v2203_v14, %v2789_v6  ;;  %v498_v19 = vpop.f32.mrb[27].mxu0 }
 0x113   :  { %v815_v21 = vsel %vm751_vm3, %v711_v13, 0.0  ;;  %v499_v22 = vadd.f32 %v2789_v6, %v498_v19 }
 0x114   :  { %v809_v23 = vrot.slane %v808_v16, 4  ;;  %v817_v25 = vadd.f32 %v816_v17, %v815_v21  ;;  %v714_v26 = vmax.f32 %v504_v18, 0.0 }
 0x115   :  { %v713_v27 = vmax.f32 %v499_v22, 0.0  ;;  %v2206_v28 = vpop.f32.mrb[28].mxu0 }
 0x116   :  { %v810_v29 = vadd.f32 %v809_v23, %v808_v16  ;;  %v514_v31 = vadd.f32 %v2206_v28, %v2789_v6  ;;  %v508_v32 = vpop.f32.mrb[29].mxu0  ;;  %v820_v39 = vsel %vm751_vm3, %v714_v26, 0.0 }
 0x117   :  { %v818_v33 = vsel %vm751_vm3, %v713_v27, 0.0  ;;  %v509_v34 = vadd.f32 %v2789_v6, %v508_v32 }
 0x118   :  { %v811_v36 = vrot.slane %v810_v29, 2  ;;  %v819_v37 = vadd.f32 %v818_v33, %v817_v25  ;;  %v716_v40 = vmax.f32 %v514_v31, 0.0 }
 0x119   :  { %v715_v41 = vmax.f32 %v509_v34, 0.0  ;;  %v2209_v38 = vpop.f32.mrb[30].mxu0 }
 0x11a   :  { %v812_v43 = vadd.f32 %v811_v36, %v810_v29  ;;  %v821_v44 = vadd.f32 %v820_v39, %v819_v37  ;;  %v524_v46 = vadd.f32 %v2209_v38, %v2789_v6  ;;  %v518_v48 = vpop.f32.mrb[31].mxu0  ;;  %v824_v53 = vsel %vm751_vm3, %v716_v40, 0.0 }
 0x11b   :  { %v822_v49 = vsel %vm751_vm3, %v715_v41, 0.0  ;;  %v519_v50 = vadd.f32 %v2789_v6, %v518_v48 }
 0x11c   :  { %v813_v51 = vrot.slane %v812_v43, 1  ;;  %v823_v52 = vadd.f32 %v822_v49, %v821_v44  ;;  %v718_v54 = vmax.f32 %v524_v46, 0.0 }
 0x11d   :  { %v717_v55 = vmax.f32 %v519_v50, 0.0  ;;  %v2212_v56 = vpop.f32.mrb[32].mxu0 }
 0x11e   :  { %v814_v57 = vadd.f32 %v813_v51, %v812_v43  ;;  %v825_v58 = vadd.f32 %v824_v53, %v823_v52  ;;  %v534_v59 = vadd.f32 %v2212_v56, %v2789_v6  ;;  %v528_v60 = vpop.f32.mrb[33].mxu0  ;;  %v828_v2 = vsel %vm751_vm3, %v718_v54, 0.0 }
 0x11f   :  { %v826_v61 = vsel %vm751_vm3, %v717_v55, 0.0  ;;  %v529_v62 = vadd.f32 %v2789_v6, %v528_v60 }
 0x120   :  { %v922_v63 = vmul.f32 0.015625, %v814_v57  ;;  %v827_v0 = vadd.f32 %v826_v61, %v825_v58  ;;  %v720_v1 = vmax.f32 %v534_v59, 0.0 }
 0x121   :  { %v719_v3 = vmax.f32 %v529_v62, 0.0  ;;  %v2215_v5 = vpop.f32.mrb[34].mxu0 }
 0x122   :  { %v943_v7 = vsel %vm942_vm5, %v922_v63, %v941_v15  ;;  %v829_v8 = vadd.f32 %v828_v2, %v827_v0  ;;  %v837_v9 = vsel %vm751_vm3, %v720_v1, 0.0  ;;  %v544_v10 = vadd.f32 %v2215_v5, %v2789_v6  ;;  %v538_v11 = vpop.f32.mrb[35].mxu0 }
 0x123   :  { %v836_v12 = vsel %vm751_vm3, %v719_v3, 0.0  ;;  %v539_v13 = vadd.f32 %v2789_v6, %v538_v11 }
 0x124   :  { %v830_v14 = vrot.slane %v829_v8, 4  ;;  %v838_v16 = vadd.f32 %v837_v9, %v836_v12  ;;  %v722_v17 = vmax.f32 %v544_v10, 0.0 }
 0x125   :  { %v721_v18 = vmax.f32 %v539_v13, 0.0  ;;  %v2218_v19 = vpop.f32.mrb[36].mxu0 }
 0x126   :  { %v831_v21 = vadd.f32 %v830_v14, %v829_v8  ;;  %v554_v22 = vadd.f32 %v2218_v19, %v2789_v6  ;;  %v548_v23 = vpop.f32.mrb[37].mxu0  ;;  %v841_v28 = vsel %vm751_vm3, %v722_v17, 0.0 }
 0x127   :  { %v839_v15 = vsel %vm751_vm3, %v721_v18, 0.0  ;;  %v549_v25 = vadd.f32 %v2789_v6, %v548_v23 }
 0x128   :  { %v832_v26 = vrot.slane %v831_v21, 2  ;;  %v840_v27 = vadd.f32 %v839_v15, %v838_v16  ;;  %v724_v29 = vmax.f32 %v554_v22, 0.0 }
 0x129   :  { %v723_v31 = vmax.f32 %v549_v25, 0.0  ;;  %v2221_v32 = vpop.f32.mrb[38].mxu0 }
 0x12a   :  { %v833_v33 = vadd.f32 %v832_v26, %v831_v21  ;;  %v842_v34 = vadd.f32 %v841_v28, %v840_v27  ;;  %v564_v36 = vadd.f32 %v2221_v32, %v2789_v6  ;;  %v558_v37 = vpop.f32.mrb[39].mxu0  ;;  %v845_v43 = vsel %vm751_vm3, %v724_v29, 0.0 }
 0x12b   :  { %v843_v39 = vsel %vm751_vm3, %v723_v31, 0.0  ;;  %v559_v40 = vadd.f32 %v2789_v6, %v558_v37 }
 0x12c   :  { %v834_v41 = vrot.slane %v833_v33, 1  ;;  %v844_v38 = vadd.f32 %v843_v39, %v842_v34  ;;  %v726_v44 = vmax.f32 %v564_v36, 0.0 }
 0x12d   :  { %v725_v46 = vmax.f32 %v559_v40, 0.0  ;;  %v2224_v48 = vpop.f32.mrb[40].mxu0 }
 0x12e   :  { %v835_v49 = vadd.f32 %v834_v41, %v833_v33  ;;  %v846_v50 = vadd.f32 %v845_v43, %v844_v38  ;;  %v574_v51 = vadd.f32 %v2224_v48, %v2789_v6  ;;  %v568_v52 = vpop.f32.mrb[41].mxu0  ;;  %v849_v58 = vsel %vm751_vm3, %v726_v44, 0.0 }
 0x12f   :  { %v847_v53 = vsel %vm751_vm3, %v725_v46, 0.0  ;;  %v569_v54 = vadd.f32 %v2789_v6, %v568_v52  ;;  %v619_v33 = vadd.f32 %v2789_v6, %v2799_v24  ;;  %v624_v44 = vadd.f32 %v2797_v20, %v2789_v6 }
 0x130   :  { %v923_v55 = vmul.f32 0.015625, %v835_v49  ;;  %v848_v56 = vadd.f32 %v847_v53, %v846_v50  ;;  %v728_v57 = vmax.f32 %v574_v51, 0.0  ;;  %v629_v52 = vadd.f32 %v2789_v6, %v2807_v35 }
 0x131   :  { %v727_v59 = vmax.f32 %v569_v54, 0.0  ;;  %v2227_v60 = vpop.f32.mrb[42].mxu0  ;;  %v737_v51 = vmax.f32 %v619_v33, 0.0  ;;  %v738_v20 = vmax.f32 %v624_v44, 0.0  ;;  %v639_v35 = vadd.f32 %v2789_v6, %v2815_v47 }
 0x132   :  { %v945_v61 = vsel %vm944_vm6, %v923_v55, %v943_v7  ;;  %v850_v62 = vadd.f32 %v849_v58, %v848_v56  ;;  %v858_v63 = vsel %vm751_vm3, %v728_v57, 0.0  ;;  %v584_v0 = vadd.f32 %v2227_v60, %v2789_v6  ;;  %v578_v1 = vpop.f32.mrb[43].mxu0 }
 0x133   :  { %v857_v2 = vsel %vm751_vm3, %v727_v59, 0.0  ;;  %v579_v3 = vadd.f32 %v2789_v6, %v578_v1  ;;  %v634_v58 = vadd.f32 %v2804_v30, %v2789_v6  ;;  %v914_v30 = vrot.slane %v2860_v45, 4 }
 0x134   :  { %v851_v5 = vrot.slane %v850_v62, 4  ;;  %v859_v8 = vadd.f32 %v858_v63, %v857_v2  ;;  %v730_v9 = vmax.f32 %v584_v0, 0.0  ;;  %v881_v63 = vsel %vm751_vm3, %v737_v51, 0.0 }
 0x135   :  { %v729_v10 = vmax.f32 %v579_v3, 0.0  ;;  %v2230_v11 = vpop.f32.mrb[44].mxu0  ;;  %v739_v0 = vmax.f32 %v629_v52, 0.0  ;;  %v883_v3 = vsel %vm751_vm3, %v738_v20, 0.0 }
 0x136   :  { %v852_v12 = vadd.f32 %v851_v5, %v850_v62  ;;  %v594_v13 = vadd.f32 %v2230_v11, %v2789_v6  ;;  %v588_v14 = vpop.f32.mrb[45].mxu0  ;;  %v862_v19 = vsel %vm751_vm3, %v730_v9, 0.0  ;;  %v740_v5 = vmax.f32 %v634_v58, 0.0 }
 0x137   :  { %v860_v7 = vsel %vm751_vm3, %v729_v10, 0.0  ;;  %v589_v16 = vadd.f32 %v2789_v6, %v588_v14  ;;  %v885_v10 = vsel %vm751_vm3, %v739_v0, 0.0  ;;  %v741_v11 = vmax.f32 %v639_v35, 0.0 }
 0x138   :  { %v853_v17 = vrot.slane %v852_v12, 2  ;;  %v861_v18 = vadd.f32 %v860_v7, %v859_v8  ;;  %v732_v21 = vmax.f32 %v594_v13, 0.0  ;;  %v887_v14 = vsel %vm751_vm3, %v740_v5, 0.0 }
 0x139   :  { %v731_v22 = vmax.f32 %v589_v16, 0.0  ;;  %v2233_v23 = vpop.f32.mrb[46].mxu0  ;;  %v915_v7 = vadd.f32 %v914_v30, %v2860_v45 }
 0x13a   :  { %v854_v15 = vadd.f32 %v853_v17, %v852_v12  ;;  %v863_v25 = vadd.f32 %v862_v19, %v861_v18  ;;  %v604_v26 = vadd.f32 %v2233_v23, %v2789_v6  ;;  %v598_v27 = vpop.f32.mrb[47].mxu0  ;;  %v866_v34 = vsel %vm751_vm3, %v732_v21, 0.0 }
 0x13b   :  { %v864_v28 = vsel %vm751_vm3, %v731_v22, 0.0  ;;  %v599_v29 = vadd.f32 %v2789_v6, %v598_v27  ;;  %v889_v18 = vsel %vm751_vm3, %v741_v11, 0.0  ;;  %v916_v21 = vrot.slane %v915_v7, 2 }
 0x13c   :  { %v855_v31 = vrot.slane %v854_v15, 1  ;;  %v865_v32 = vadd.f32 %v864_v28, %v863_v25  ;;  %v734_v36 = vmax.f32 %v604_v26, 0.0 }
 0x13d   :  { %v733_v37 = vmax.f32 %v599_v29, 0.0  ;;  %v2236_v39 = vpop.f32.mrb[48].mxu0  ;;  %v917_v26 = vadd.f32 %v916_v21, %v915_v7 }
 0x13e   :  { %v856_v40 = vadd.f32 %v855_v31, %v854_v15  ;;  %v867_v41 = vadd.f32 %v866_v34, %v865_v32  ;;  %v614_v38 = vadd.f32 %v2236_v39, %v2789_v6  ;;  %v608_v43 = vpop.f32.mrb[49].mxu0  ;;  %v870_v53 = vsel %vm751_vm3, %v734_v36, 0.0  ;;  %v20_v39 = vld [vmem:[%s3116_s3] sm:$0xff] }
 0x13f   :  { %v868_v46 = vsel %vm751_vm3, %v733_v37, 0.0  ;;  %v609_v48 = vadd.f32 %v2789_v6, %v608_v43  ;;  %v918_v29 = vrot.slane %v917_v26, 1  ;;  %v1026_v43 = vld [vmem:[%s3117_s1] sm:$0x3f] }
 0x140   :  { %v924_v49 = vmul.f32 0.015625, %v856_v40  ;;  %v869_v24 = vadd.f32 %v868_v46, %v867_v41  ;;  %v736_v50 = vmax.f32 %v614_v38, 0.0  ;;  %v22_v40 = vld [vmem:[%s3116_s3 + $0x10] sm:$0xff]  ;;  %v23_v41 = vld [vmem:[%s3116_s3 + $0x18] sm:$0xff]  ;;  %v2477_v46 = vmov 0.0|0.0  }
 0x141   :  { %v735_v54 = vmax.f32 %v609_v48, 0.0  ;;  %v919_v32 = vadd.f32 %v918_v29, %v917_v26  ;;  %v2956_v44 = vpack.c.bf16 %v23_v41, %v22_v40  ;;  %v24_v48 = vld [vmem:[%s3116_s3 + $0x20] sm:$0xff] }
 0x142   :  { %v871_v55 = vadd.f32 %v870_v53, %v869_v24  ;;  %v879_v56 = vsel %vm751_vm3, %v736_v50, 0.0  ;;  %v947_v57 = vsel %vm946_vm7, %v924_v49, %v945_v61  ;;  %v644_v61 = vadd.f32 %v2812_v42, %v2789_v6  ;;  %v25_v49 = vld [vmem:[%s3116_s3 + $0x28] sm:$0xff]  ;;  %v1104_v50 = vld [vmem:[%s3118_s2] sm:$0x3] }
 0x143   :  { %v878_v59 = vsel %vm751_vm3, %v735_v54, 0.0  ;;  %v927_v36 = vmul.f32 0.015625, %v919_v32  ;;  %v2967_v24 = vpack.c.bf16 %v25_v49, %v24_v48 }
 0x144   :  { %v872_v60 = vrot.slane %v871_v55, 4  ;;  %v880_v62 = vadd.f32 %v879_v56, %v878_v59  ;;  %v742_v47 = vmax.f32 %v644_v61, 0.0 }
 0x146   :  { %v873_v1 = vadd.f32 %v872_v60, %v871_v55  ;;  %v882_v2 = vadd.f32 %v881_v63, %v880_v62  ;;  %v891_v42 = vsel %vm751_vm3, %v742_v47, 0.0  ;;  %v2025_v55 = vld [vmem:[%s3116_s3 + $0x30] ss:$0 sm:$0xff]  ;;  %v1105_v60 = vld [vmem:[%s3118_s2 + $0x2] sm:$0x3] }
 0x148   :  { %v874_v8 = vrot.slane %v873_v1, 2  ;;  %v884_v9 = vadd.f32 %v883_v3, %v882_v2 }
 0x14a   :  { %v875_v12 = vadd.f32 %v874_v8, %v873_v1  ;;  %v886_v13 = vadd.f32 %v885_v10, %v884_v9 }
 0x14c   :  { %v876_v16 = vrot.slane %v875_v12, 1  ;;  %v888_v17 = vadd.f32 %v887_v14, %v886_v13 }
 0x14e   :  { %v877_v19 = vadd.f32 %v876_v16, %v875_v12  ;;  %v890_v6 = vadd.f32 %v889_v18, %v888_v17 }
 0x150   :  { %v925_v22 = vmul.f32 0.015625, %v877_v19  ;;  %v892_v23 = vadd.f32 %v891_v42, %v890_v6 }
 0x152   :  { %v893_v15 = vrot.slane %v892_v23, 4  ;;  %v949_v25 = vsel %vm948_vm8, %v925_v22, %v947_v57 }
 0x154   :  { %v894_v27 = vadd.f32 %v893_v15, %v892_v23 }
 0x156   :  { %v895_v28 = vrot.slane %v894_v27, 2 }
 0x158   :  { %v896_v31 = vadd.f32 %v895_v28, %v894_v27 }
 0x15a   :  { %v897_v45 = vrot.slane %v896_v31, 1 }
 0x15c   :  { %v898_v33 = vadd.f32 %v897_v45, %v896_v31 }
 0x15e   :  { %v926_v34 = vmul.f32 0.015625, %v898_v33 }
 0x160   :  { %v951_v37 = vsel %vm950_vm9, %v926_v34, %v949_v25 }
 0x161   :  { %v953_v38 = vsel %vm952_vm10, %v927_v36, %v951_v37 }
 0x162   :  { %2261 = vmatmul.mubr.msk.f32.vlgmr.msra.gmra.mrb[14].mxu1 %vm751_vm3, %v953_v38 }
 0x163   :  { %2264 = vmatpush3.msra.mxu1 %v20_v39  ;;  %2265 = vmatprep.mubr.msk.f32.mxu1 %vm2476_vm2, %v2475_v4 }
 0x164   :  { %2360 = vmatprep.subr.bf16.mxu1 %v2477_v46 }
 0x166   :  { %2266 = vmatmul.mubr.msk.f32.vlgmr.msra.gmra.mrb[16].mxu1 %vm751_vm3, %v1026_v43 }
 0x167   :  { %2362 = vmatpush3.bf16.msra.mxu1 %v2956_v44  ;;  %2276 = vmatprep.mubr.msk.f32.mxu1 %vm2476_vm2, %v2475_v4 }
 0x168   :  { %2363 = vmatprep.subr.bf16.mxu1 %v2477_v46 }
 0x16b   :  { %2365 = vmatpush3.bf16.msra.mxu1 %v2967_v24 }
 0x16c   :  { %2366 = vmatprep.subr.bf16.mxu1 %v2477_v46 }
 0x16e   :  { %2277 = vmatmul.mubr.msk.f32.vlgmr.msra.gmra.mrb[18].mxu1 %vm1106_vm11, %v1104_v50 }
 0x16f   :  { %2368 = vmatpush3.bf16.msra.mxu1 %v2956_v44  ;;  %2287 = vmatprep.mubr.msk.f32.mxu1 %vm2476_vm2, %v2475_v4 }
 0x170   :  { %2369 = vmatprep.subr.bf16.mxu1 %v2477_v46 }
 0x173   :  { %2371 = vmatpush3.bf16.msra.mxu1 %v2967_v24 }
 0x174   :  { %2372 = vmatprep.subr.bf16.mxu1 %v2477_v46 }
 0x235   :  { %v2984_v51 = vpop.f32.mrb[14].mxu1 }
 0x236   :  { %v2262_v52 = vpop.f32.mrb[15].mxu1 }
 0x239   :  { %v1100_v53 = vpop.f32.mrb[16].mxu1 }
 0x23a   :  { %v2267_v54 = vpop.f32.mrb[17].mxu1  ;;  %v2989_v56 = vadd.f32 %v2025_v55, %v1100_v53 }
 0x241   :  { %v1176_v57 = vpop.f32.mrb[18].mxu1 }
 0x242   :  { %v1180_v20 = vadd.f32 %v1176_v57, %v2989_v56  ;;  %v2278_v58 = vpop.f32.mrb[19].mxu1 }
 0x243   :  { %v2023_v58 = vld [vmem:[%s3116_s3 + $0x31] ss:$0 sm:$0xff] }
 0x244   :  { %2419 = vtanh.f32 %v1180_v20  ;;  %v2028_v62 = vmul.f32 -1.442695, %v1180_v20 }
 0x246   :  { %2421 = vpow2.f32 %v2028_v62 }
 0x24e   :  { %v2420_v59 = vpop.eup %2419 }
 0x24f   :  { %1194 = vrot.lane.b32.xlu0 %v2420_v59, %s2478_s20  ;;  %v3041_v59 = vadd.f32 %v2023_v58, %v2984_v51 }
 0x250   :  { %v2422_v63 = vpop.eup %2421 }
 0x251   :  { %v1184_v0 = vadd.f32 1.0, %v2422_v63 }
 0x253   :  { %1189 = vrot.lane.b32.xlu0 %v1105_v60, %s2479_s23  ;;  %2423 = vrcp.f32 %v1184_v0 }
 0x25d   :  { %v2424_v35 = vpop.eup %2423 }
 0x2c1   :  { %v1195_v1 = vpop.permute.xlu0 %1194 }
 0x2c2   :  { %v1197_v2 = vmul.f32 %v2424_v35, %v1195_v1 }
 0x2c4   :  { %1199 = vrot.lane.b32.xlu1 %v1197_v2, %s2479_s23 }
 0x2c5   :  { %v1190_v3 = vpop.permute.xlu0 %1189 }
 0x2c6   :  { %v1192_v5 = vmul.f32 %v2424_v35, %v1190_v3 }
 0x336   :  { %v1200_v61 = vpop.permute.xlu1 %1199 }
 0x337   :  { %v1202_v30 = vadd.f32 %v1200_v61, %v1192_v5 }
 0x339   :  { %2425 = vtanh.f32 %v1202_v30  ;;  %v1296_v21 = vrot.slane %v1202_v30, 6 }
 0x343   :  { %v2426_v8 = vpop.eup %2425 }
 0x344   :  { %1205 = vrot.lane.b32.xlu1 %v2426_v8, %s2478_s20 }
 0x3b6   :  { %v1206_v9 = vpop.permute.xlu1 %1205 }
 0x3b7   :  { %v2999_v10 = vmul.f32 %v2424_v35, %v1206_v9 }
 0x3b9   :  { %1210 = vrot.lane.b32.xlu0 %v2999_v10, %s2479_s23 }
 0x42b   :  { %v1211_v11 = vpop.permute.xlu0 %1210 }
 0x42c   :  { %2288 = vmatmul.mubr.msk.f32.vlgmr.msra.gmra.mrb[20].mxu1 %vm1106_vm11, %v1211_v11 }
 0x42d   :  { %2374 = vmatpush3.bf16.msra.mxu1 %v2956_v44  ;;  %2298 = vmatprep.mubr.msk.f32.mxu1 %vm2476_vm2, %v2475_v4 }
 0x42e   :  { %2375 = vmatprep.subr.bf16.mxu1 %v2477_v46 }
 0x431   :  { %2377 = vmatpush3.bf16.msra.mxu1 %v2967_v24 }
 0x432   :  { %2378 = vmatprep.subr.bf16.mxu1 %v2477_v46 }
 0x4ff   :  { %v1280_v12 = vpop.f32.mrb[20].mxu1 }
 0x500   :  { %v1285_v13 = vrot.slane %v1280_v12, 6  ;;  %v2289_v14 = vpop.f32.mrb[21].mxu1 }
 0x502   :  { %v1287_v47 = vadd.f32 %v1285_v13, %v2989_v56 }
 0x504   :  { %2427 = vtanh.f32 %v1287_v47  ;;  %v2030_v16 = vmul.f32 -1.442695, %v1287_v47 }
 0x506   :  { %2429 = vpow2.f32 %v2030_v16 }
 0x50e   :  { %v2428_v7 = vpop.eup %2427 }
 0x50f   :  { %1300 = vrot.lane.b32.xlu1 %v2428_v7, %s2478_s20 }
 0x510   :  { %v2430_v17 = vpop.eup %2429 }
 0x511   :  { %v1291_v18 = vadd.f32 1.0, %v2430_v17 }
 0x513   :  { %2431 = vrcp.f32 %v1291_v18 }
 0x51d   :  { %v2432_v19 = vpop.eup %2431 }
 0x51e   :  { %v1298_v22 = vmul.f32 %v2432_v19, %v1296_v21 }
 0x581   :  { %v1301_v6 = vpop.permute.xlu1 %1300 }
 0x582   :  { %v1303_v42 = vmul.f32 %v2432_v19, %v1301_v6 }
 0x584   :  { %1305 = vrot.lane.b32.xlu0 %v1303_v42, %s2479_s23 }
 0x5f6   :  { %v1306_v23 = vpop.permute.xlu0 %1305 }
 0x5f7   :  { %v1308_v15 = vadd.f32 %v1306_v23, %v1298_v22 }
 0x5f9   :  { %2433 = vtanh.f32 %v1308_v15  ;;  %v1403_v43 = vrot.slane %v1308_v15, 6 }
 0x603   :  { %v2434_v25 = vpop.eup %2433 }
 0x604   :  { %1311 = vrot.lane.b32.xlu1 %v2434_v25, %s2478_s20 }
 0x676   :  { %v1312_v26 = vpop.permute.xlu1 %1311 }
 0x677   :  { %v1314_v27 = vmul.f32 %v2432_v19, %v1312_v26 }
 0x679   :  { %v1316_v28 = vrot.slane %v1314_v27, 2  ;;  %v1854_v55 = vsel %vm298_vm1, %v2999_v10, %v1314_v27 }
 0x67b   :  { %1317 = vrot.lane.b32.xlu0 %v1316_v28, %s2479_s23 }
 0x6ed   :  { %v1318_v29 = vpop.permute.xlu0 %1317 }
 0x6ee   :  { %2299 = vmatmul.mubr.msk.f32.vlgmr.msra.gmra.mrb[22].mxu1 %vm1106_vm11, %v1318_v29 }
 0x6ef   :  { %2380 = vmatpush3.bf16.msra.mxu1 %v2956_v44  ;;  %2309 = vmatprep.mubr.msk.f32.mxu1 %vm2476_vm2, %v2475_v4 }
 0x6f0   :  { %2381 = vmatprep.subr.bf16.mxu1 %v2477_v46 }
 0x6f3   :  { %2383 = vmatpush3.bf16.msra.mxu1 %v2967_v24 }
 0x6f4   :  { %2384 = vmatprep.subr.bf16.mxu1 %v2477_v46 }
 0x7c1   :  { %v1387_v31 = vpop.f32.mrb[22].mxu1 }
 0x7c2   :  { %v1392_v45 = vrot.slane %v1387_v31, 4  ;;  %v2300_v32 = vpop.f32.mrb[23].mxu1 }
 0x7c4   :  { %v1394_v33 = vadd.f32 %v1392_v45, %v2989_v56 }
 0x7c6   :  { %2435 = vtanh.f32 %v1394_v33  ;;  %v2032_v36 = vmul.f32 -1.442695, %v1394_v33 }
 0x7c8   :  { %2437 = vpow2.f32 %v2032_v36 }
 0x7d0   :  { %v2436_v34 = vpop.eup %2435 }
 0x7d1   :  { %1407 = vrot.lane.b32.xlu1 %v2436_v34, %s2478_s20 }
 0x7d2   :  { %v2438_v37 = vpop.eup %2437 }
 0x7d3   :  { %v1398_v39 = vadd.f32 1.0, %v2438_v37 }
 0x7d5   :  { %2439 = vrcp.f32 %v1398_v39 }
 0x7df   :  { %v2440_v40 = vpop.eup %2439 }
 0x7e0   :  { %v1405_v48 = vmul.f32 %v2440_v40, %v1403_v43 }
 0x843   :  { %v1408_v41 = vpop.permute.xlu1 %1407 }
 0x844   :  { %v1410_v38 = vmul.f32 %v2440_v40, %v1408_v41 }
 0x846   :  { %1412 = vrot.lane.b32.xlu0 %v1410_v38, %s2479_s23 }
 0x8b8   :  { %v1413_v49 = vpop.permute.xlu0 %1412 }
 0x8b9   :  { %v1415_v50 = vadd.f32 %v1413_v49, %v1405_v48 }
 0x8bb   :  { %2441 = vtanh.f32 %v1415_v50  ;;  %v1507_v51 = vrot.slane %v1415_v50, 4 }
 0x8c5   :  { %v2442_v52 = vpop.eup %2441 }
 0x8c6   :  { %1418 = vrot.lane.b32.xlu1 %v2442_v52, %s2478_s20 }
 0x938   :  { %v1419_v53 = vpop.permute.xlu1 %1418 }
 0x939   :  { %v1421_v54 = vmul.f32 %v2440_v40, %v1419_v53 }
 0x93b   :  { %v1423_v56 = vrot.slane %v1421_v54, 4  ;;  %v1856_v57 = vsel %vm1855_vm12, %v1854_v55, %v1421_v54 }
 0x93d   :  { %1424 = vrot.lane.b32.xlu0 %v1423_v56, %s2479_s23 }
 0x9af   :  { %v1425_v20 = vpop.permute.xlu0 %1424 }
 0x9b0   :  { %2310 = vmatmul.mubr.msk.f32.vlgmr.msra.gmra.mrb[24].mxu1 %vm1106_vm11, %v1425_v20 }
 0x9b1   :  { %2386 = vmatpush3.bf16.msra.mxu1 %v2956_v44  ;;  %2320 = vmatprep.mubr.msk.f32.mxu1 %vm2476_vm2, %v2475_v4 }
 0x9b2   :  { %2387 = vmatprep.subr.bf16.mxu1 %v2477_v46 }
 0x9b5   :  { %2389 = vmatpush3.bf16.msra.mxu1 %v2967_v24 }
 0x9b6   :  { %2390 = vmatprep.subr.bf16.mxu1 %v2477_v46 }
 0xa83   :  { %v1494_v60 = vpop.f32.mrb[24].mxu1 }
 0xa84   :  { %v1498_v62 = vadd.f32 %v1494_v60, %v3041_v59  ;;  %v2311_v63 = vpop.f32.mrb[25].mxu1 }
 0xa86   :  { %2443 = vtanh.f32 %v1498_v62  ;;  %v2034_v35 = vmul.f32 -1.442695, %v1498_v62 }
 0xa88   :  { %2445 = vpow2.f32 %v2034_v35 }
 0xa90   :  { %v2444_v0 = vpop.eup %2443 }
 0xa91   :  { %1511 = vrot.lane.b32.xlu1 %v2444_v0, %s2478_s20 }
 0xa92   :  { %v2446_v1 = vpop.eup %2445 }
 0xa93   :  { %v1502_v2 = vadd.f32 1.0, %v2446_v1 }
 0xa95   :  { %2447 = vrcp.f32 %v1502_v2 }
 0xa9f   :  { %v2448_v3 = vpop.eup %2447 }
 0xaa0   :  { %v1509_v30 = vmul.f32 %v2448_v3, %v1507_v51 }
 0xb03   :  { %v1512_v5 = vpop.permute.xlu1 %1511 }
 0xb04   :  { %v1514_v61 = vmul.f32 %v2448_v3, %v1512_v5 }
 0xb06   :  { %1516 = vrot.lane.b32.xlu0 %v1514_v61, %s2479_s23 }
 0xb78   :  { %v1517_v8 = vpop.permute.xlu0 %1516 }
 0xb79   :  { %v1519_v9 = vadd.f32 %v1517_v8, %v1509_v30  ;;  %v32_v8 = vld [vmem:[%s3114_s4 + $0x20] sm:$0xff] }
 0xb7b   :  { %2449 = vtanh.f32 %v1519_v9  ;;  %v1613_v25 = vrot.slane %v1519_v9, 6  ;;  %v33_v9 = vld [vmem:[%s3114_s4 + $0x28] sm:$0xff] }
 0xb85   :  { %v2450_v10 = vpop.eup %2449 }
 0xb86   :  { %1522 = vrot.lane.b32.xlu1 %v2450_v10, %s2478_s20  ;;  %v34_v10 = vld [vmem:[%s3114_s4 + $0x30] sm:$0xff] }
 0xbf8   :  { %v1523_v11 = vpop.permute.xlu1 %1522 }
 0xbf9   :  { %v1525_v12 = vmul.f32 %v2448_v3, %v1523_v11  ;;  %v2402_v11 = vpack.c.bf16 %v33_v9, %v32_v8 }
 0xbfb   :  { %v1846_v13 = vrot.slane %v1525_v12, 2  ;;  %1527 = vrot.lane.b32.xlu0 %v1525_v12, %s2479_s23  ;;  %v35_v12 = vld [vmem:[%s3114_s4 + $0x38] sm:$0xff] }
 0xbfd   :  { %v3048_v14 = vsel %vm1857_vm13, %v1856_v57, %v1846_v13  ;;  %v2406_v13 = vpack.c.bf16 %v35_v12, %v34_v10 }
 0xc6d   :  { %v1528_v47 = vpop.permute.xlu0 %1527 }
 0xc6e   :  { %2321 = vmatmul.mubr.msk.f32.vlgmr.msra.gmra.mrb[26].mxu1 %vm1106_vm11, %v1528_v47 }
 0xc6f   :  { %2392 = vmatpush3.bf16.msra.mxu1 %v2956_v44  ;;  %2331 = vmatprep.mubr.msk.f32.mxu1 %vm2476_vm2, %v2475_v4 }
 0xc70   :  { %2393 = vmatprep.subr.bf16.mxu1 %v2477_v46 }
 0xc73   :  { %2395 = vmatpush3.bf16.msra.mxu1 %v2967_v24 }
 0xc74   :  { %2396 = vmatprep.subr.bf16.mxu1 %v2477_v46 }
 0xd41   :  { %v1597_v7 = vpop.f32.mrb[26].mxu1 }
 0xd42   :  { %v1602_v16 = vrot.slane %v1597_v7, 6  ;;  %v2322_v17 = vpop.f32.mrb[27].mxu1 }
 0xd44   :  { %v1604_v18 = vadd.f32 %v1602_v16, %v3041_v59 }
 0xd46   :  { %2451 = vtanh.f32 %v1604_v18  ;;  %v2036_v6 = vmul.f32 -1.442695, %v1604_v18 }
 0xd48   :  { %2453 = vpow2.f32 %v2036_v6 }
 0xd50   :  { %v2452_v19 = vpop.eup %2451 }
 0xd51   :  { %1617 = vrot.lane.b32.xlu1 %v2452_v19, %s2478_s20 }
 0xd52   :  { %v2454_v42 = vpop.eup %2453 }
 0xd53   :  { %v1608_v21 = vadd.f32 1.0, %v2454_v42  ;;  %v2041_v42 = vld [vmem:[%s3114_s4 + $0x40] ss:$0 sm:$0xff] }
 0xd55   :  { %2455 = vrcp.f32 %v1608_v21 }
 0xd5f   :  { %v2456_v22 = vpop.eup %2455 }
 0xd60   :  { %v1615_v26 = vmul.f32 %v2456_v22, %v1613_v25 }
 0xdc3   :  { %v1618_v23 = vpop.permute.xlu1 %1617 }
 0xdc4   :  { %v1620_v15 = vmul.f32 %v2456_v22, %v1618_v23 }
 0xdc6   :  { %1622 = vrot.lane.b32.xlu0 %v1620_v15, %s2479_s23 }
 0xe38   :  { %v1623_v27 = vpop.permute.xlu0 %1622 }
 0xe39   :  { %v1625_v28 = vadd.f32 %v1623_v27, %v1615_v26 }
 0xe3b   :  { %2457 = vtanh.f32 %v1625_v28 }
 0xe45   :  { %v2458_v29 = vpop.eup %2457 }
 0xe46   :  { %1628 = vrot.lane.b32.xlu1 %v2458_v29, %s2478_s20 }
 0xeb8   :  { %v1629_v31 = vpop.permute.xlu1 %1628 }
 0xeb9   :  { %v3061_v45 = vmul.f32 %v2456_v22, %v1629_v31 }
 0xebb   :  { %v1633_v32 = vrot.slane %v3061_v45, 2 }
 0xebd   :  { %1634 = vrot.lane.b32.xlu0 %v1633_v32, %s2479_s23 }
 0xf2f   :  { %v1635_v33 = vpop.permute.xlu0 %1634 }
 0xf30   :  { %2332 = vmatmul.mubr.msk.f32.vlgmr.msra.gmra.mrb[28].mxu1 %vm1106_vm11, %v1635_v33 }
 0xf31   :  { %2398 = vmatpush3.bf16.msra.mxu1 %v2956_v44  ;;  %2342 = vmatprep.mubr.msk.f32.mxu1 %vm2476_vm2, %v2475_v4 }
 0xf32   :  { %2399 = vmatprep.subr.bf16.mxu1 %v2477_v46  ;;  %v1720_v46 = vrot.slane %v1625_v28, 6 }
 0xf35   :  { %2401 = vmatpush3.bf16.msra.mxu1 %v2967_v24 }
 0xf36   :  { %2403 = vmatprep.subr.bf16.mxu1 %v2402_v11 }
0x1003   :  { %v1704_v34 = vpop.f32.mrb[28].mxu1 }
0x1004   :  { %v1709_v36 = vrot.slane %v1704_v34, 4  ;;  %v2333_v37 = vpop.f32.mrb[29].mxu1 }
0x1006   :  { %v1711_v39 = vadd.f32 %v1709_v36, %v3041_v59 }
0x1008   :  { %2459 = vtanh.f32 %v1711_v39  ;;  %v2038_v41 = vmul.f32 -1.442695, %v1711_v39 }
0x100a   :  { %2461 = vpow2.f32 %v2038_v41 }
0x1012   :  { %v2460_v40 = vpop.eup %2459 }
0x1013   :  { %1724 = vrot.lane.b32.xlu1 %v2460_v40, %s2478_s20 }
0x1014   :  { %v2462_v38 = vpop.eup %2461 }
0x1015   :  { %v1715_v44 = vadd.f32 1.0, %v2462_v38 }
0x1017   :  { %2463 = vrcp.f32 %v1715_v44 }
0x1021   :  { %v2464_v43 = vpop.eup %2463 }
0x1022   :  { %v1722_v24 = vmul.f32 %v2464_v43, %v1720_v46 }
0x1085   :  { %v1725_v4 = vpop.permute.xlu1 %1724 }
0x1086   :  { %v1727_v48 = vmul.f32 %v2464_v43, %v1725_v4 }
0x1088   :  { %1729 = vrot.lane.b32.xlu0 %v1727_v48, %s2479_s23 }
0x10fa   :  { %v1730_v49 = vpop.permute.xlu0 %1729 }
0x10fb   :  { %v1732_v50 = vadd.f32 %v1730_v49, %v1722_v24 }
0x10fd   :  { %2465 = vtanh.f32 %v1732_v50  ;;  %v1827_v5 = vrot.slane %v1732_v50, 6 }
0x1107   :  { %v2466_v52 = vpop.eup %2465 }
0x1108   :  { %1735 = vrot.lane.b32.xlu1 %v2466_v52, %s2478_s20 }
0x117a   :  { %v1736_v53 = vpop.permute.xlu1 %1735 }
0x117b   :  { %v1738_v54 = vmul.f32 %v2464_v43, %v1736_v53 }
0x117d   :  { %v1740_v55 = vrot.slane %v1738_v54, 4  ;;  %v1849_v47 = vrot.slane %v1738_v54, 2 }
0x117f   :  { %1741 = vrot.lane.b32.xlu0 %v1740_v55, %s2479_s23  ;;  %v1859_v18 = vsel %vm298_vm1, %v1633_v32, %v1849_v47 }
0x11f1   :  { %v1742_v56 = vpop.permute.xlu0 %1741 }
0x11f2   :  { %2343 = vmatmul.mubr.msk.f32.vlgmr.msra.gmra.mrb[30].mxu1 %vm1106_vm11, %v1742_v56 }
0x11f3   :  { %2405 = vmatpush3.bf16.msra.mxu1 %v2402_v11 }
0x11f4   :  { %2407 = vmatprep.subr.bf16.mxu1 %v2406_v13 }
0x11f7   :  { %2409 = vmatpush3.bf16.msra.mxu1 %v2406_v13 }
0x12c5   :  { %v1811_v57 = vpop.f32.mrb[30].mxu1 }
0x12c6   :  { %v1816_v20 = vrot.slane %v1811_v57, 2  ;;  %v2344_v58 = vpop.f32.mrb[31].mxu1 }
0x12c8   :  { %v1818_v60 = vadd.f32 %v1816_v20, %v3041_v59 }
0x12ca   :  { %2467 = vtanh.f32 %v1818_v60  ;;  %v2040_v63 = vmul.f32 -1.442695, %v1818_v60 }
0x12cc   :  { %2469 = vpow2.f32 %v2040_v63 }
0x12d4   :  { %v2468_v62 = vpop.eup %2467 }
0x12d5   :  { %1831 = vrot.lane.b32.xlu1 %v2468_v62, %s2478_s20 }
0x12d6   :  { %v2470_v0 = vpop.eup %2469 }
0x12d7   :  { %v1822_v35 = vadd.f32 1.0, %v2470_v0 }
0x12d9   :  { %2471 = vrcp.f32 %v1822_v35 }
0x12e3   :  { %v2472_v1 = vpop.eup %2471 }
0x12e4   :  { %v1829_v61 = vmul.f32 %v2472_v1, %v1827_v5 }
0x1347   :  { %v1832_v2 = vpop.permute.xlu1 %1831 }
0x1348   :  { %v1834_v3 = vmul.f32 %v2472_v1, %v1832_v2 }
0x134a   :  { %1836 = vrot.lane.b32.xlu0 %v1834_v3, %s2479_s23 }
0x134e   :  { %1867 = vrot.lane.b32.xlu0 %v3048_v14, %s2479_s23 }
0x13bc   :  { %v1837_v59 = vpop.permute.xlu0 %1836 }
0x13bd   :  { %v1839_v51 = vadd.f32 %v1837_v59, %v1829_v61 }
0x13bf   :  { %2473 = vtanh.f32 %v1839_v51 }
0x13c0   :  { %v1868_v30 = vpop.permute.xlu0 %1867 }
0x13c1   :  { %2353 = vmatprep.mubr.msk.f32.mxu1 %vm1106_vm11, %v1868_v30 }
0x13c9   :  { %v2474_v14 = vpop.eup %2473 }
0x13ca   :  { %1842 = vrot.lane.b32.xlu1 %v2474_v14, %s2478_s20 }
0x143c   :  { %v1843_v7 = vpop.permute.xlu1 %1842 }
0x143d   :  { %v1845_v16 = vmul.f32 %v2472_v1, %v1843_v7 }
0x143f   :  { %v1852_v17 = vrot.slane %v1845_v16, 2 }
0x1441   :  { %v1860_v19 = vsel %vm1855_vm12, %v1859_v18, %v1852_v17 }
0x1442   :  { %1869 = vrot.lane.b32.xlu1 %v1860_v19, %s2479_s23 }
0x14b4   :  { %v1870_v6 = vpop.permute.xlu1 %1869 }
0x14b5   :  { %2354 = vmatmul.mubr.msk.f32.vlgmr.msra.gmra.mrb[32].mxu1 %vm1106_vm11, %v1870_v6 }
0x1588   :  { %v2355_v21 = vpop.f32.mrb[32].mxu1 }
0x1589   :  { %v1947_v22 = vadd.f32 %v2355_v21, %v2041_v42  ;;  %v1941_v23 = vpop.f32.mrb[33].mxu1 }
0x158a   :  { %v1942_v15 = vadd.f32 %v2041_v42, %v1941_v23 }
0x158b   :  { %1952 = vst.msk [vmem:[%s3119_s5 + $0x8] sm:$0x3f] %vm1951_vm14, %v1947_v22 }
0x158c   :  { %1950 = vst.msk [vmem:[%s3119_s5] sm:$0xff] %vm751_vm3, %v1942_v15 }

</bundles_post_ra>
